<compile_context>
chip_gen: v7x
topology: tpu7x:2x2x1
jax: 0.10.0
libtpu: 0.0.40
codegen_flags: <defaults>
</compile_context>

<pallas_src>
import functools

import jax
import jax.numpy as jnp
from jax.experimental import pallas as pl
from jax.experimental.pallas import tpu as pltpu

LANE = 128      # lane width (last-dim padding unit)
SUBLANE = 8     # sublane width
BN_EPS = 1e-5
X_RESIDENT_BYTES = 8 * 1024 * 1024   # keep x fully VMEM-resident below this size


def _round_up(x, m):
    return (x + m - 1) // m * m


def _pick_tile(n_pad, target):
    """Largest multiple of LANE <= target that exactly divides n_pad."""
    t = min(target, n_pad)
    t = (t // LANE) * LANE
    while n_pad % t:
        t -= LANE
    return t


# ----------------------------------------------------------------------------
# Kernel 1: SAGEConv (A@x aggregation + two fused projection dots) and
#           per-row-tile BatchNorm sufficient statistics.
# Grid: (row_tiles [parallel], k_tiles over source nodes [arbitrary]).
# ----------------------------------------------------------------------------
def sage_matmul_kernel(a_ref, xk_ref, xi_ref, dinv_ref, wl_ref, wr_ref,
                       h_ref, psum_ref, psumsq_ref, agg_ref,
                       *, tk, x_resident):
    k = pl.program_id(1)

    @pl.when(k == 0)
    def _():
        agg_ref[...] = jnp.zeros_like(agg_ref)

    # int8 edge counts -> bf16 (exact for small counts) feeding the MXU
    a_tile = a_ref[...].astype(jnp.bfloat16)
    if x_resident:
        start = pl.multiple_of(k * tk, tk)
        xk = xk_ref[pl.ds(start, tk), :]
    else:
        xk = xk_ref[...]
    agg_ref[...] += jnp.dot(a_tile, xk, preferred_element_type=jnp.float32)

    @pl.when(k == pl.num_programs(1) - 1)
    def _():
        # exact f32 mean normalization (1/deg), then two accumulating MXU dots
        mean_agg = agg_ref[...] * dinv_ref[...]
        h = jnp.dot(mean_agg.astype(jnp.bfloat16), wl_ref[...],
                    preferred_element_type=jnp.float32)
        h = h + jnp.dot(xi_ref[...], wr_ref[...],
                        preferred_element_type=jnp.float32)
        # partial BatchNorm statistics for this row tile (padded rows are 0)
        colsum = jnp.sum(h, axis=0, keepdims=True)
        colsq = jnp.sum(h * h, axis=0, keepdims=True)
        psum_ref[...] = jnp.broadcast_to(colsum, psum_ref.shape)
        psumsq_ref[...] = jnp.broadcast_to(colsq, psumsq_ref.shape)
        h_ref[...] = h.astype(h_ref.dtype)


def sage_matmul(adj, x, deg_inv, wl, wr, *, tm, tk):
    n_pad = adj.shape[0]
    c_in_pad = x.shape[1]
    c_out_pad = wl.shape[1]
    n_row_tiles = n_pad // tm
    x_resident = n_pad * c_in_pad * x.dtype.itemsize <= X_RESIDENT_BYTES
    xk_spec = (pl.BlockSpec((n_pad, c_in_pad), lambda i, k: (0, 0)) if x_resident
               else pl.BlockSpec((tk, c_in_pad), lambda i, k: (k, 0)))
    kernel = functools.partial(sage_matmul_kernel, tk=tk, x_resident=x_resident)
    return pl.pallas_call(
        kernel,
        out_shape=(
            jax.ShapeDtypeStruct((n_pad, c_out_pad), jnp.bfloat16),
            jax.ShapeDtypeStruct((SUBLANE * n_row_tiles, c_out_pad), jnp.float32),
            jax.ShapeDtypeStruct((SUBLANE * n_row_tiles, c_out_pad), jnp.float32),
        ),
        grid=(n_row_tiles, n_pad // tk),
        in_specs=[
            pl.BlockSpec((tm, tk), lambda i, k: (i, k)),          # A tile (int8)
            xk_spec,                                              # x (contraction)
            pl.BlockSpec((tm, c_in_pad), lambda i, k: (i, 0)),    # x (root/self)
            pl.BlockSpec((tm, 1), lambda i, k: (i, 0)),           # 1/deg (f32)
            pl.BlockSpec((c_in_pad, c_out_pad), lambda i, k: (0, 0)),  # Wl
            pl.BlockSpec((c_in_pad, c_out_pad), lambda i, k: (0, 0)),  # Wr
        ],
        out_specs=(
            pl.BlockSpec((tm, c_out_pad), lambda i, k: (i, 0)),
            pl.BlockSpec((SUBLANE, c_out_pad), lambda i, k: (i, 0)),
            pl.BlockSpec((SUBLANE, c_out_pad), lambda i, k: (i, 0)),
        ),
        scratch_shapes=[pltpu.VMEM((tm, c_in_pad), jnp.float32)],
        compiler_params=pltpu.CompilerParams(
            dimension_semantics=("parallel", "arbitrary"),
            vmem_limit_bytes=32 * 1024 * 1024,
        ),
    )(adj, x, x, deg_inv, wl, wr)


# ----------------------------------------------------------------------------
# Kernel 2: folded BatchNorm (h*scale+shift) + ReLU + in-kernel row mask
#           (intermediate layers).
# ----------------------------------------------------------------------------
def bn_relu_kernel(h_ref, scale_ref, shift_ref, o_ref, *, tm, n_real):
    hn = h_ref[...].astype(jnp.float32) * scale_ref[...] + shift_ref[...]
    hn = jnp.maximum(hn, 0.0)
    row = (pl.program_id(0) * tm
           + jax.lax.broadcasted_iota(jnp.int32, hn.shape, 0))
    o_ref[...] = jnp.where(row < n_real, hn, 0.0).astype(o_ref.dtype)


def bn_relu(h, scale, shift, *, tm, n_real):
    n_pad, c_pad = h.shape
    kernel = functools.partial(bn_relu_kernel, tm=tm, n_real=n_real)
    return pl.pallas_call(
        kernel,
        out_shape=jax.ShapeDtypeStruct((n_pad, c_pad), jnp.bfloat16),
        grid=(n_pad // tm,),
        in_specs=[
            pl.BlockSpec((tm, c_pad), lambda i: (i, 0)),
            pl.BlockSpec((1, c_pad), lambda i: (0, 0)),
            pl.BlockSpec((1, c_pad), lambda i: (0, 0)),
        ],
        out_specs=pl.BlockSpec((tm, c_pad), lambda i: (i, 0)),
        compiler_params=pltpu.CompilerParams(
            dimension_semantics=("parallel",)),
    )(h, scale, shift)


# ----------------------------------------------------------------------------
# Kernel 3 (last layer): folded BN + ReLU + final Linear + softmax, fused.
# Emits x_pre_fc and x_post_fc from one kernel.
# ----------------------------------------------------------------------------
def bn_relu_fc_softmax_kernel(h_ref, scale_ref, shift_ref, wfc_ref, bfc_ref,
                              xpre_ref, xpost_ref, *, tm, n_real, n_cls):
    hn = h_ref[...].astype(jnp.float32) * scale_ref[...] + shift_ref[...]
    hn = jnp.maximum(hn, 0.0)
    row = (pl.program_id(0) * tm
           + jax.lax.broadcasted_iota(jnp.int32, hn.shape, 0))
    xpre = jnp.where(row < n_real, hn, 0.0)
    xpre_ref[...] = xpre
    logits = (jnp.dot(xpre.astype(wfc_ref.dtype), wfc_ref[...],
                      preferred_element_type=jnp.float32) + bfc_ref[...])
    # mask padded class columns out of the softmax (static class count)
    col = jax.lax.broadcasted_iota(jnp.int32, logits.shape, 1)
    logits = jnp.where(col < n_cls, logits, -1e30)
    m = jnp.max(logits, axis=1, keepdims=True)
    e = jnp.exp(logits - m)
    denom = jnp.sum(e, axis=1, keepdims=True)
    xpost_ref[...] = e / denom      # exact reciprocal: rows sum to 1 (f32 rounding)


def bn_relu_fc_softmax(h, scale, shift, wfc, bfc, *, tm, n_real, n_cls):
    n_pad, c_pad = h.shape
    c_cls_pad = wfc.shape[1]
    kernel = functools.partial(bn_relu_fc_softmax_kernel,
                               tm=tm, n_real=n_real, n_cls=n_cls)
    return pl.pallas_call(
        kernel,
        out_shape=(
            jax.ShapeDtypeStruct((n_pad, c_pad), jnp.float32),
            jax.ShapeDtypeStruct((n_pad, c_cls_pad), jnp.float32),
        ),
        grid=(n_pad // tm,),
        in_specs=[
            pl.BlockSpec((tm, c_pad), lambda i: (i, 0)),
            pl.BlockSpec((1, c_pad), lambda i: (0, 0)),
            pl.BlockSpec((1, c_pad), lambda i: (0, 0)),
            pl.BlockSpec((c_pad, c_cls_pad), lambda i: (0, 0)),
            pl.BlockSpec((1, c_cls_pad), lambda i: (0, 0)),
        ],
        out_specs=(
            pl.BlockSpec((tm, c_pad), lambda i: (i, 0)),
            pl.BlockSpec((tm, c_cls_pad), lambda i: (i, 0)),
        ),
        compiler_params=pltpu.CompilerParams(
            dimension_semantics=("parallel",)),
    )(h, scale, shift, wfc, bfc)


# ----------------------------------------------------------------------------
# JAX glue (tiny, not the hot path)
# ----------------------------------------------------------------------------
def build_adjacency(edge_index, n_pad):
    # edge_index int32 [2, E], row 0 = src, row 1 = dst (PyG: mean over incoming
    # messages x_src at dst; nodes without in-edges aggregate to 0).
    # Stored as exact int8 edge counts; 1/deg applied in f32 inside the kernel.
    src, dst = edge_index[0], edge_index[1]
    a = jnp.zeros((n_pad, n_pad), jnp.float32)
    a = a.at[dst, src].add(1.0)
    deg = jnp.sum(a, axis=1, keepdims=True)
    deg_inv = jnp.where(deg > 0.0, 1.0 / deg, 0.0)     # f32 [n_pad, 1]
    return a.astype(jnp.int8), deg_inv


def bn_scale_shift(psum, psumsq, gamma, beta, n_real):
    # Reduce per-row-tile sufficient stats -> folded BN affine (scale, shift).
    n_row_tiles = psum.shape[0] // SUBLANE
    c_pad = psum.shape[1]
    s = jnp.sum(psum.reshape(n_row_tiles, SUBLANE, c_pad)[:, 0, :], axis=0)
    ss = jnp.sum(psumsq.reshape(n_row_tiles, SUBLANE, c_pad)[:, 0, :], axis=0)
    mean = s / n_real
    var = jnp.maximum(ss / n_real - mean * mean, 0.0)   # biased variance
    scale = gamma * jax.lax.rsqrt(var + BN_EPS)         # (1, C_pad)
    shift = beta - mean * scale
    return scale, shift


# ----------------------------------------------------------------------------
# Parameter init (deterministic, synthetic, pre-padded / bf16).
# ----------------------------------------------------------------------------
def init_params(key, in_channels, hidden_channels, num_classes):
    layers = []
    c_prev = in_channels
    for c in hidden_channels:
        k1, k2, key = jax.random.split(key, 3)
        wl = 0.1 * jax.random.normal(k1, (c_prev, c), jnp.float32)
        wr = 0.1 * jax.random.normal(k2, (c_prev, c), jnp.float32)
        cin_p = _round_up(c_prev, LANE)
        cout_p = _round_up(c, LANE)
        wl_p = jnp.zeros((cin_p, cout_p), jnp.float32).at[:c_prev, :c].set(wl)
        wr_p = jnp.zeros((cin_p, cout_p), jnp.float32).at[:c_prev, :c].set(wr)
        # SAGEConv bias omitted (exactly cancels under the following BatchNorm)
        gamma = jnp.zeros((1, cout_p), jnp.float32).at[:, :c].set(1.0)
        beta = jnp.zeros((1, cout_p), jnp.float32)
        layers.append(dict(wl=wl_p.astype(jnp.bfloat16),
                           wr=wr_p.astype(jnp.bfloat16),
                           gamma=gamma, beta=beta))
        c_prev = c
    k1, k2, key = jax.random.split(key, 3)
    w = 0.1 * jax.random.normal(k1, (c_prev, num_classes), jnp.float32)
    b = 0.1 * jax.random.normal(k2, (1, num_classes), jnp.float32)
    chid_p = _round_up(c_prev, LANE)
    ccls_p = _round_up(num_classes, LANE)
    wfc = jnp.zeros((chid_p, ccls_p), jnp.float32).at[:c_prev, :num_classes].set(w)
    bfc = jnp.zeros((1, ccls_p), jnp.float32).at[:, :num_classes].set(b)
    fc = dict(w=wfc.astype(jnp.bfloat16), b=bfc)
    return layers, fc


# ----------------------------------------------------------------------------
# Full forward pass.
# ----------------------------------------------------------------------------
@functools.partial(jax.jit, static_argnums=(4, 5, 6))
def gcn_forward(x, edge_index, layer_params, fc_params,
                num_nodes, hidden_last, num_classes):
    n = num_nodes
    n_pad = _round_up(max(n, LANE), LANE)
    # Tiles always divide n_pad exactly (no dropped trailing tiles); sized for
    # large HBM-efficient blocks while staying well under v7x's 64 MiB VMEM.
    tm = _pick_tile(n_pad, 512)        # aggregation row tile
    tk = _pick_tile(n_pad, 2048)       # aggregation contraction tile
    tm_e = _pick_tile(n_pad, 1024)     # elementwise / FC row tile

    c_in = x.shape[1]
    c_in_pad = _round_up(c_in, LANE)

    adj, deg_inv = build_adjacency(edge_index, n_pad)   # int8 counts + f32 1/deg
    x_pad = jnp.zeros((n_pad, c_in_pad), jnp.float32).at[:n, :c_in].set(x)
    x_pad = x_pad.astype(jnp.bfloat16)

    h_in = x_pad
    for p in layer_params[:-1]:
        h, ps, pss = sage_matmul(adj, h_in, deg_inv, p["wl"], p["wr"], tm=tm, tk=tk)
        scale, shift = bn_scale_shift(ps, pss, p["gamma"], p["beta"], n)
        h_in = bn_relu(h, scale, shift, tm=tm_e, n_real=n)

    # last layer: BN + ReLU fused with the final Linear + softmax
    p = layer_params[-1]
    h, ps, pss = sage_matmul(adj, h_in, deg_inv, p["wl"], p["wr"], tm=tm, tk=tk)
    scale, shift = bn_scale_shift(ps, pss, p["gamma"], p["beta"], n)
    x_pre_pad, x_post_pad = bn_relu_fc_softmax(
        h, scale, shift, fc_params["w"], fc_params["b"],
        tm=tm_e, n_real=n, n_cls=num_classes)

    return x_pre_pad[:n, :hidden_last], x_post_pad[:n, :num_classes]


if __name__ == "__main__":
    # Small synthetic graph: N nodes, E directed edges, deterministic.
    N = 16
    IN_CH = 8
    HIDDEN = (32, 16)
    NUM_CLASSES = 4
    E = 48

    key = jax.random.PRNGKey(0)
    kx, ke, kp = jax.random.split(key, 3)

    x = jax.random.normal(kx, (N, IN_CH), jnp.float32)
    edge_index = jax.random.randint(ke, (2, E), 0, N, jnp.int32)

    layer_params, fc_params = init_params(kp, IN_CH, HIDDEN, NUM_CLASSES)

    x_pre_fc, x_post_fc = gcn_forward(x, edge_index, tuple(layer_params),
                                      fc_params, N, HIDDEN[-1], NUM_CLASSES)
    jax.block_until_ready((x_pre_fc, x_post_fc))

    assert x_pre_fc.shape == (N, HIDDEN[-1])
    assert x_post_fc.shape == (N, NUM_CLASSES)
    # exact reciprocal in the softmax -> rows sum to 1 within f32 rounding
    sums = jnp.sum(x_post_fc, axis=1)
    assert bool(jnp.allclose(sums, 1.0, atol=1e-3)), sums
    assert bool(jnp.all(jnp.isfinite(x_pre_fc))) and bool(jnp.all(jnp.isfinite(x_post_fc)))

    print("KERNEL_OK")
</pallas_src>

<mosaic_0001>
module attributes {stable_mosaic.version = 11 : i64} {
  func.func private @main(%arg0: i32) attributes {dimension_semantics = [#tpu.dimension_semantics<core_parallel>], iteration_bounds = array<i64: 2>, tpu.core_type = #tpu.core_type<sc_scalar_subcore>, window_params = []} {
    return
  }
}

module attributes {stable_mosaic.version = 11 : i64} {
  func.func private @main(%arg0: i32) attributes {dimension_semantics = [#tpu.dimension_semantics<core_parallel>], iteration_bounds = array<i64: 2>, tpu.core_type = #tpu.core_type<sc_scalar_subcore>, window_params = []} {
    return
  }
}

module attributes {stable_mosaic.version = 11 : i64} {
  func.func @sage_matmul_kernel(%arg0: i32, %arg1: i32, %arg2: memref<128x128xi8, #tpu.memory_space<vmem>>, %arg3: memref<128x128xbf16, #tpu.memory_space<vmem>>, %arg4: memref<128x128xbf16, #tpu.memory_space<vmem>>, %arg5: memref<128x1xf32, #tpu.memory_space<vmem>>, %arg6: memref<128x128xbf16, #tpu.memory_space<vmem>>, %arg7: memref<128x128xbf16, #tpu.memory_space<vmem>>, %arg8: memref<128x128xbf16, #tpu.memory_space<vmem>>, %arg9: memref<8x128xf32, #tpu.memory_space<vmem>>, %arg10: memref<8x128xf32, #tpu.memory_space<vmem>>, %arg11: memref<128x128xf32, #tpu.memory_space<vmem>>) attributes {dimension_semantics = [#tpu.dimension_semantics<parallel>, #tpu.dimension_semantics<arbitrary>], iteration_bounds = array<i64: 1, 1>, scalar_prefetch = 0 : i64, scratch_operands = 1 : i64, tpu.core_type = #tpu.core_type<tc>, window_params = [{transform_indices = @transform_0, window_bounds = array<i64: 128, 128>}, {pipeline_mode = #tpu.pipeline_mode<synchronous>, transform_indices = @transform_1, window_bounds = array<i64: 128, 128>}, {transform_indices = @transform_2, window_bounds = array<i64: 128, 128>}, {transform_indices = @transform_3, window_bounds = array<i64: 128, 1>}, {pipeline_mode = #tpu.pipeline_mode<synchronous>, transform_indices = @transform_4, window_bounds = array<i64: 128, 128>}, {pipeline_mode = #tpu.pipeline_mode<synchronous>, transform_indices = @transform_5, window_bounds = array<i64: 128, 128>}, {transform_indices = @transform_6, window_bounds = array<i64: 128, 128>}, {transform_indices = @transform_7, window_bounds = array<i64: 8, 128>}, {transform_indices = @transform_8, window_bounds = array<i64: 8, 128>}]} {
    %c0_i32 = arith.constant 0 : i32
    %0 = arith.cmpi eq, %arg1, %c0_i32 : i32
    %1 = arith.extui %0 : i1 to i32
    %c0_i32_0 = arith.constant 0 : i32
    %2 = arith.cmpi ne, %1, %c0_i32_0 : i32
    scf.if %2 {
      %cst_9 = arith.constant 0.000000e+00 : f32
      %16 = vector.broadcast %cst_9 : f32 to vector<128x128xf32>
      %c0_10 = arith.constant 0 : index
      %c0_11 = arith.constant 0 : index
      %17 = vector.load %arg11[%c0_10, %c0_11] : memref<128x128xf32, #tpu.memory_space<vmem>>, vector<128x128xf32>
      tpu.vector_store %arg11[%c0_10, %c0_11], %16 {strides = array<i32>} : memref<128x128xf32, #tpu.memory_space<vmem>>, vector<128x128xf32>,
    } else {
    }
    %c0 = arith.constant 0 : index
    %c0_1 = arith.constant 0 : index
    %3 = vector.load %arg2[%c0, %c0_1] : memref<128x128xi8, #tpu.memory_space<vmem>>, vector<128x128xi8>
    %4 = arith.sitofp %3 : vector<128x128xi8> to vector<128x128xbf16>
    %c128_i32 = arith.constant 128 : i32
    %5 = arith.muli %arg1, %c128_i32 : i32
    %6 = tpu.assume_multiple %5, 128 : i32
    %7 = arith.index_cast %6 : i32 to index
    %c0_2 = arith.constant 0 : index
    %8 = vector.load %arg3[%7, %c0_2] : memref<128x128xbf16, #tpu.memory_space<vmem>>, vector<128x128xbf16>
    %c0_3 = arith.constant 0 : index
    %c0_4 = arith.constant 0 : index
    %9 = vector.load %arg11[%c0_3, %c0_4] : memref<128x128xf32, #tpu.memory_space<vmem>>, vector<128x128xf32>
    %cst = arith.constant dense<0.000000e+00> : vector<128x128xf32>
    %10 = tpu.matmul %4, %8, %cst {dimension_numbers = #tpu.dot_dimension_numbers<[1], [0], [0], [1], [0, 0, 1, 1], [], []>} : vector<128x128xbf16>, vector<128x128xbf16>, vector<128x128xf32> -> vector<128x128xf32>
    %11 = arith.addf %9, %10 : vector<128x128xf32>
    %c0_5 = arith.constant 0 : index
    %c0_6 = arith.constant 0 : index
    %12 = vector.load %arg11[%c0_5, %c0_6] : memref<128x128xf32, #tpu.memory_space<vmem>>, vector<128x128xf32>
    tpu.vector_store %arg11[%c0_5, %c0_6], %11 {strides = array<i32>} : memref<128x128xf32, #tpu.memory_space<vmem>>, vector<128x128xf32>,
    %c0_i32_7 = arith.constant 0 : i32
    %13 = arith.cmpi eq, %arg1, %c0_i32_7 : i32
    %14 = arith.extui %13 : i1 to i32
    %c0_i32_8 = arith.constant 0 : i32
    %15 = arith.cmpi ne, %14, %c0_i32_8 : i32
    scf.if %15 {
      %c0_9 = arith.constant 0 : index
      %c0_10 = arith.constant 0 : index
      %16 = vector.load %arg11[%c0_9, %c0_10] : memref<128x128xf32, #tpu.memory_space<vmem>>, vector<128x128xf32>
      %c0_11 = arith.constant 0 : index
      %c0_12 = arith.constant 0 : index
      %17 = vector.load %arg5[%c0_11, %c0_12] : memref<128x1xf32, #tpu.memory_space<vmem>>, vector<128x1xf32>
      %18 = vector.broadcast %17 : vector<128x1xf32> to vector<128x128xf32>
      %19 = arith.mulf %16, %18 : vector<128x128xf32>
      %20 = arith.truncf %19 : vector<128x128xf32> to vector<128x128xbf16>
      %c0_13 = arith.constant 0 : index
      %c0_14 = arith.constant 0 : index
      %21 = vector.load %arg6[%c0_13, %c0_14] : memref<128x128xbf16, #tpu.memory_space<vmem>>, vector<128x128xbf16>
      %cst_15 = arith.constant dense<0.000000e+00> : vector<128x128xf32>
      %22 = tpu.matmul %20, %21, %cst_15 {dimension_numbers = #tpu.dot_dimension_numbers<[1], [0], [0], [1], [0, 0, 1, 1], [], []>} : vector<128x128xbf16>, vector<128x128xbf16>, vector<128x128xf32> -> vector<128x128xf32>
      %c0_16 = arith.constant 0 : index
      %c0_17 = arith.constant 0 : index
      %23 = vector.load %arg4[%c0_16, %c0_17] : memref<128x128xbf16, #tpu.memory_space<vmem>>, vector<128x128xbf16>
      %c0_18 = arith.constant 0 : index
      %c0_19 = arith.constant 0 : index
      %24 = vector.load %arg7[%c0_18, %c0_19] : memref<128x128xbf16, #tpu.memory_space<vmem>>, vector<128x128xbf16>
      %cst_20 = arith.constant dense<0.000000e+00> : vector<128x128xf32>
      %25 = tpu.matmul %23, %24, %cst_20 {dimension_numbers = #tpu.dot_dimension_numbers<[1], [0], [0], [1], [0, 0, 1, 1], [], []>} : vector<128x128xbf16>, vector<128x128xbf16>, vector<128x128xf32> -> vector<128x128xf32>
      %26 = arith.addf %22, %25 : vector<128x128xf32>
      %cst_21 = arith.constant dense<0.000000e+00> : vector<128xf32>
      %27 = vector.multi_reduction <add>, %26, %cst_21 [0] : vector<128x128xf32> to vector<128xf32>
      %28 = vector.shape_cast %27 : vector<128xf32> to vector<1x128xf32>
      %29 = arith.mulf %26, %26 : vector<128x128xf32>
      %cst_22 = arith.constant dense<0.000000e+00> : vector<128xf32>
      %30 = vector.multi_reduction <add>, %29, %cst_22 [0] : vector<128x128xf32> to vector<128xf32>
      %31 = vector.shape_cast %30 : vector<128xf32> to vector<1x128xf32>
      %32 = vector.shape_cast %28 : vector<1x128xf32> to vector<1x128xf32>
      %33 = vector.broadcast %32 : vector<1x128xf32> to vector<8x128xf32>
      %c0_23 = arith.constant 0 : index
      %c0_24 = arith.constant 0 : index
      %34 = vector.load %arg9[%c0_23, %c0_24] : memref<8x128xf32, #tpu.memory_space<vmem>>, vector<8x128xf32>
      tpu.vector_store %arg9[%c0_23, %c0_24], %33 {strides = array<i32>} : memref<8x128xf32, #tpu.memory_space<vmem>>, vector<8x128xf32>,
      %35 = vector.shape_cast %31 : vector<1x128xf32> to vector<1x128xf32>
      %36 = vector.broadcast %35 : vector<1x128xf32> to vector<8x128xf32>
      %c0_25 = arith.constant 0 : index
      %c0_26 = arith.constant 0 : index
      %37 = vector.load %arg10[%c0_25, %c0_26] : memref<8x128xf32, #tpu.memory_space<vmem>>, vector<8x128xf32>
      tpu.vector_store %arg10[%c0_25, %c0_26], %36 {strides = array<i32>} : memref<8x128xf32, #tpu.memory_space<vmem>>, vector<8x128xf32>,
      %38 = arith.truncf %26 : vector<128x128xf32> to vector<128x128xbf16>
      %c0_27 = arith.constant 0 : index
      %c0_28 = arith.constant 0 : index
      %39 = vector.load %arg8[%c0_27, %c0_28] : memref<128x128xbf16, #tpu.memory_space<vmem>>, vector<128x128xbf16>
      tpu.vector_store %arg8[%c0_27, %c0_28], %38 {strides = array<i32>} : memref<128x128xbf16, #tpu.memory_space<vmem>>, vector<128x128xbf16>,
    } else {
    }
    return
  }
  func.func @transform_0(%arg0: i32, %arg1: i32) -> (i32, i32) {
    %c0_i32 = arith.constant 0 : i32
    return %arg0, %arg1 : i32, i32
  }
  func.func @transform_1(%arg0: i32, %arg1: i32) -> (i32, i32) {
    %c0_i32 = arith.constant 0 : i32
    %c0_i32_0 = arith.constant 0 : i32
    %c0_i32_1 = arith.constant 0 : i32
    return %c0_i32, %c0_i32_0 : i32, i32
  }
  func.func @transform_2(%arg0: i32, %arg1: i32) -> (i32, i32) {
    %c0_i32 = arith.constant 0 : i32
    %c0_i32_0 = arith.constant 0 : i32
    return %arg0, %c0_i32 : i32, i32
  }
  func.func @transform_3(%arg0: i32, %arg1: i32) -> (i32, i32) {
    %c0_i32 = arith.constant 0 : i32
    %c0_i32_0 = arith.constant 0 : i32
    return %arg0, %c0_i32 : i32, i32
  }
  func.func @transform_4(%arg0: i32, %arg1: i32) -> (i32, i32) {
    %c0_i32 = arith.constant 0 : i32
    %c0_i32_0 = arith.constant 0 : i32
    %c0_i32_1 = arith.constant 0 : i32
    return %c0_i32, %c0_i32_0 : i32, i32
  }
  func.func @transform_5(%arg0: i32, %arg1: i32) -> (i32, i32) {
    %c0_i32 = arith.constant 0 : i32
    %c0_i32_0 = arith.constant 0 : i32
    %c0_i32_1 = arith.constant 0 : i32
    return %c0_i32, %c0_i32_0 : i32, i32
  }
  func.func @transform_6(%arg0: i32, %arg1: i32) -> (i32, i32) {
    %c0_i32 = arith.constant 0 : i32
    %c0_i32_0 = arith.constant 0 : i32
    return %arg0, %c0_i32 : i32, i32
  }
  func.func @transform_7(%arg0: i32, %arg1: i32) -> (i32, i32) {
    %c0_i32 = arith.constant 0 : i32
    %c0_i32_0 = arith.constant 0 : i32
    return %arg0, %c0_i32 : i32, i32
  }
  func.func @transform_8(%arg0: i32, %arg1: i32) -> (i32, i32) {
    %c0_i32 = arith.constant 0 : i32
    %c0_i32_0 = arith.constant 0 : i32
    return %arg0, %c0_i32 : i32, i32
  }
}

module attributes {stable_mosaic.version = 11 : i64} {
  func.func @bn_relu_kernel(%arg0: i32, %arg1: memref<128x128xbf16, #tpu.memory_space<vmem>>, %arg2: memref<1x128xf32, #tpu.memory_space<vmem>>, %arg3: memref<1x128xf32, #tpu.memory_space<vmem>>, %arg4: memref<128x128xbf16, #tpu.memory_space<vmem>>) attributes {dimension_semantics = [#tpu.dimension_semantics<parallel>], iteration_bounds = array<i64: 1>, scalar_prefetch = 0 : i64, scratch_operands = 0 : i64, tpu.core_type = #tpu.core_type<tc>, window_params = [{transform_indices = @transform_0, window_bounds = array<i64: 128, 128>}, {pipeline_mode = #tpu.pipeline_mode<synchronous>, transform_indices = @transform_1, window_bounds = array<i64: 1, 128>}, {pipeline_mode = #tpu.pipeline_mode<synchronous>, transform_indices = @transform_2, window_bounds = array<i64: 1, 128>}, {transform_indices = @transform_3, window_bounds = array<i64: 128, 128>}]} {
    %c0 = arith.constant 0 : index
    %c0_0 = arith.constant 0 : index
    %0 = vector.load %arg1[%c0, %c0_0] : memref<128x128xbf16, #tpu.memory_space<vmem>>, vector<128x128xbf16>
    %1 = arith.extf %0 : vector<128x128xbf16> to vector<128x128xf32>
    %c0_1 = arith.constant 0 : index
    %c0_2 = arith.constant 0 : index
    %2 = vector.load %arg2[%c0_1, %c0_2] : memref<1x128xf32, #tpu.memory_space<vmem>>, vector<1x128xf32>
    %3 = vector.broadcast %2 : vector<1x128xf32> to vector<128x128xf32>
    %4 = arith.mulf %1, %3 : vector<128x128xf32>
    %c0_3 = arith.constant 0 : index
    %c0_4 = arith.constant 0 : index
    %5 = vector.load %arg3[%c0_3, %c0_4] : memref<1x128xf32, #tpu.memory_space<vmem>>, vector<1x128xf32>
    %6 = vector.broadcast %5 : vector<1x128xf32> to vector<128x128xf32>
    %7 = arith.addf %4, %6 : vector<128x128xf32>
    %cst = arith.constant 0.000000e+00 : f32
    %8 = vector.broadcast %cst : f32 to vector<128x128xf32>
    %9 = arith.maximumf %7, %8 : vector<128x128xf32>
    %c128_i32 = arith.constant 128 : i32
    %10 = arith.muli %arg0, %c128_i32 : i32
    %11 = tpu.iota {dimensions = array<i32: 0>} : vector<128x128xi32>
    %12 = vector.broadcast %10 : i32 to vector<128x128xi32>
    %13 = arith.addi %12, %11 : vector<128x128xi32>
    %c16_i32 = arith.constant 16 : i32
    %14 = vector.broadcast %c16_i32 : i32 to vector<128x128xi32>
    %15 = arith.cmpi slt, %13, %14 : vector<128x128xi32>
    %cst_5 = arith.constant 0.000000e+00 : f32
    %16 = vector.broadcast %cst_5 : f32 to vector<128x128xf32>
    %17 = arith.select %15, %9, %16 : vector<128x128xi1>, vector<128x128xf32>
    %18 = arith.truncf %17 : vector<128x128xf32> to vector<128x128xbf16>
    %c0_6 = arith.constant 0 : index
    %c0_7 = arith.constant 0 : index
    %19 = vector.load %arg4[%c0_6, %c0_7] : memref<128x128xbf16, #tpu.memory_space<vmem>>, vector<128x128xbf16>
    tpu.vector_store %arg4[%c0_6, %c0_7], %18 {strides = array<i32>} : memref<128x128xbf16, #tpu.memory_space<vmem>>, vector<128x128xbf16>,
    return
  }
  func.func @transform_0(%arg0: i32) -> (i32, i32) {
    %c0_i32 = arith.constant 0 : i32
    %c0_i32_0 = arith.constant 0 : i32
    return %arg0, %c0_i32 : i32, i32
  }
  func.func @transform_1(%arg0: i32) -> (i32, i32) {
    %c0_i32 = arith.constant 0 : i32
    %c0_i32_0 = arith.constant 0 : i32
    %c0_i32_1 = arith.constant 0 : i32
    return %c0_i32, %c0_i32_0 : i32, i32
  }
  func.func @transform_2(%arg0: i32) -> (i32, i32) {
    %c0_i32 = arith.constant 0 : i32
    %c0_i32_0 = arith.constant 0 : i32
    %c0_i32_1 = arith.constant 0 : i32
    return %c0_i32, %c0_i32_0 : i32, i32
  }
  func.func @transform_3(%arg0: i32) -> (i32, i32) {
    %c0_i32 = arith.constant 0 : i32
    %c0_i32_0 = arith.constant 0 : i32
    return %arg0, %c0_i32 : i32, i32
  }
}

module attributes {stable_mosaic.version = 11 : i64} {
  func.func @bn_relu_fc_softmax_kernel(%arg0: i32, %arg1: memref<128x128xbf16, #tpu.memory_space<vmem>>, %arg2: memref<1x128xf32, #tpu.memory_space<vmem>>, %arg3: memref<1x128xf32, #tpu.memory_space<vmem>>, %arg4: memref<128x128xbf16, #tpu.memory_space<vmem>>, %arg5: memref<1x128xf32, #tpu.memory_space<vmem>>, %arg6: memref<128x128xf32, #tpu.memory_space<vmem>>, %arg7: memref<128x128xf32, #tpu.memory_space<vmem>>) attributes {dimension_semantics = [#tpu.dimension_semantics<parallel>], iteration_bounds = array<i64: 1>, scalar_prefetch = 0 : i64, scratch_operands = 0 : i64, tpu.core_type = #tpu.core_type<tc>, window_params = [{transform_indices = @transform_0, window_bounds = array<i64: 128, 128>}, {pipeline_mode = #tpu.pipeline_mode<synchronous>, transform_indices = @transform_1, window_bounds = array<i64: 1, 128>}, {pipeline_mode = #tpu.pipeline_mode<synchronous>, transform_indices = @transform_2, window_bounds = array<i64: 1, 128>}, {pipeline_mode = #tpu.pipeline_mode<synchronous>, transform_indices = @transform_3, window_bounds = array<i64: 128, 128>}, {pipeline_mode = #tpu.pipeline_mode<synchronous>, transform_indices = @transform_4, window_bounds = array<i64: 1, 128>}, {transform_indices = @transform_5, window_bounds = array<i64: 128, 128>}, {transform_indices = @transform_6, window_bounds = array<i64: 128, 128>}]} {
    %c0 = arith.constant 0 : index
    %c0_0 = arith.constant 0 : index
    %0 = vector.load %arg1[%c0, %c0_0] : memref<128x128xbf16, #tpu.memory_space<vmem>>, vector<128x128xbf16>
    %1 = arith.extf %0 : vector<128x128xbf16> to vector<128x128xf32>
    %c0_1 = arith.constant 0 : index
    %c0_2 = arith.constant 0 : index
    %2 = vector.load %arg2[%c0_1, %c0_2] : memref<1x128xf32, #tpu.memory_space<vmem>>, vector<1x128xf32>
    %3 = vector.broadcast %2 : vector<1x128xf32> to vector<128x128xf32>
    %4 = arith.mulf %1, %3 : vector<128x128xf32>
    %c0_3 = arith.constant 0 : index
    %c0_4 = arith.constant 0 : index
    %5 = vector.load %arg3[%c0_3, %c0_4] : memref<1x128xf32, #tpu.memory_space<vmem>>, vector<1x128xf32>
    %6 = vector.broadcast %5 : vector<1x128xf32> to vector<128x128xf32>
    %7 = arith.addf %4, %6 : vector<128x128xf32>
    %cst = arith.constant 0.000000e+00 : f32
    %8 = vector.broadcast %cst : f32 to vector<128x128xf32>
    %9 = arith.maximumf %7, %8 : vector<128x128xf32>
    %c128_i32 = arith.constant 128 : i32
    %10 = arith.muli %arg0, %c128_i32 : i32
    %11 = tpu.iota {dimensions = array<i32: 0>} : vector<128x128xi32>
    %12 = vector.broadcast %10 : i32 to vector<128x128xi32>
    %13 = arith.addi %12, %11 : vector<128x128xi32>
    %c16_i32 = arith.constant 16 : i32
    %14 = vector.broadcast %c16_i32 : i32 to vector<128x128xi32>
    %15 = arith.cmpi slt, %13, %14 : vector<128x128xi32>
    %cst_5 = arith.constant 0.000000e+00 : f32
    %16 = vector.broadcast %cst_5 : f32 to vector<128x128xf32>
    %17 = arith.select %15, %9, %16 : vector<128x128xi1>, vector<128x128xf32>
    %c0_6 = arith.constant 0 : index
    %c0_7 = arith.constant 0 : index
    %18 = vector.load %arg6[%c0_6, %c0_7] : memref<128x128xf32, #tpu.memory_space<vmem>>, vector<128x128xf32>
    tpu.vector_store %arg6[%c0_6, %c0_7], %17 {strides = array<i32>} : memref<128x128xf32, #tpu.memory_space<vmem>>, vector<128x128xf32>,
    %19 = arith.truncf %17 : vector<128x128xf32> to vector<128x128xbf16>
    %c0_8 = arith.constant 0 : index
    %c0_9 = arith.constant 0 : index
    %20 = vector.load %arg4[%c0_8, %c0_9] : memref<128x128xbf16, #tpu.memory_space<vmem>>, vector<128x128xbf16>
    %cst_10 = arith.constant dense<0.000000e+00> : vector<128x128xf32>
    %21 = tpu.matmul %19, %20, %cst_10 {dimension_numbers = #tpu.dot_dimension_numbers<[1], [0], [0], [1], [0, 0, 1, 1], [], []>} : vector<128x128xbf16>, vector<128x128xbf16>, vector<128x128xf32> -> vector<128x128xf32>
    %c0_11 = arith.constant 0 : index
    %c0_12 = arith.constant 0 : index
    %22 = vector.load %arg5[%c0_11, %c0_12] : memref<1x128xf32, #tpu.memory_space<vmem>>, vector<1x128xf32>
    %23 = vector.broadcast %22 : vector<1x128xf32> to vector<128x128xf32>
    %24 = arith.addf %21, %23 : vector<128x128xf32>
    %25 = tpu.iota {dimensions = array<i32: 1>} : vector<128x128xi32>
    %c4_i32 = arith.constant 4 : i32
    %26 = vector.broadcast %c4_i32 : i32 to vector<128x128xi32>
    %27 = arith.cmpi slt, %25, %26 : vector<128x128xi32>
    %cst_13 = arith.constant -1.000000e+30 : f32
    %28 = vector.broadcast %cst_13 : f32 to vector<128x128xf32>
    %29 = arith.select %27, %24, %28 : vector<128x128xi1>, vector<128x128xf32>
    %cst_14 = arith.constant dense<0xFF800000> : vector<128xf32>
    %30 = vector.multi_reduction <maximumf>, %29, %cst_14 [1] : vector<128x128xf32> to vector<128xf32>
    %31 = vector.shape_cast %30 : vector<128xf32> to vector<128x1xf32>
    %32 = vector.broadcast %31 : vector<128x1xf32> to vector<128x128xf32>
    %33 = arith.subf %29, %32 : vector<128x128xf32>
    %34 = math.exp %33 : vector<128x128xf32>
    %cst_15 = arith.constant dense<0.000000e+00> : vector<128xf32>
    %35 = vector.multi_reduction <add>, %34, %cst_15 [1] : vector<128x128xf32> to vector<128xf32>
    %36 = vector.shape_cast %35 : vector<128xf32> to vector<128x1xf32>
    %37 = vector.broadcast %36 : vector<128x1xf32> to vector<128x128xf32>
    %38 = arith.divf %34, %37 : vector<128x128xf32>
    %c0_16 = arith.constant 0 : index
    %c0_17 = arith.constant 0 : index
    %39 = vector.load %arg7[%c0_16, %c0_17] : memref<128x128xf32, #tpu.memory_space<vmem>>, vector<128x128xf32>
    tpu.vector_store %arg7[%c0_16, %c0_17], %38 {strides = array<i32>} : memref<128x128xf32, #tpu.memory_space<vmem>>, vector<128x128xf32>,
    return
  }
  func.func @transform_0(%arg0: i32) -> (i32, i32) {
    %c0_i32 = arith.constant 0 : i32
    %c0_i32_0 = arith.constant 0 : i32
    return %arg0, %c0_i32 : i32, i32
  }
  func.func @transform_1(%arg0: i32) -> (i32, i32) {
    %c0_i32 = arith.constant 0 : i32
    %c0_i32_0 = arith.constant 0 : i32
    %c0_i32_1 = arith.constant 0 : i32
    return %c0_i32, %c0_i32_0 : i32, i32
  }
  func.func @transform_2(%arg0: i32) -> (i32, i32) {
    %c0_i32 = arith.constant 0 : i32
    %c0_i32_0 = arith.constant 0 : i32
    %c0_i32_1 = arith.constant 0 : i32
    return %c0_i32, %c0_i32_0 : i32, i32
  }
  func.func @transform_3(%arg0: i32) -> (i32, i32) {
    %c0_i32 = arith.constant 0 : i32
    %c0_i32_0 = arith.constant 0 : i32
    %c0_i32_1 = arith.constant 0 : i32
    return %c0_i32, %c0_i32_0 : i32, i32
  }
  func.func @transform_4(%arg0: i32) -> (i32, i32) {
    %c0_i32 = arith.constant 0 : i32
    %c0_i32_0 = arith.constant 0 : i32
    %c0_i32_1 = arith.constant 0 : i32
    return %c0_i32, %c0_i32_0 : i32, i32
  }
  func.func @transform_5(%arg0: i32) -> (i32, i32) {
    %c0_i32 = arith.constant 0 : i32
    %c0_i32_0 = arith.constant 0 : i32
    return %arg0, %c0_i32 : i32, i32
  }
  func.func @transform_6(%arg0: i32) -> (i32, i32) {
    %c0_i32 = arith.constant 0 : i32
    %c0_i32_0 = arith.constant 0 : i32
    return %arg0, %c0_i32 : i32, i32
  }
}

</mosaic_0001>

<bundles_post_ra>
// kernel: gcn_forward.5
= control target key start
LH: loop header
LB: loop body
LE: loop exit
PB: predicated region body
PF: predicated region fallthrough
CT: control target
= control target key end

     0   :  { %v289_v2 = vmov 0.0|0.0   ;;  %s364_s0 = inlined_call_operand.vmem [shape: bf16[128,128], index: 0, kind: input, shape index: {}]   ;;  %s365_s1 = inlined_call_operand.vmem [shape: f32[1,128], index: 1, kind: input, shape index: {}]   ;;  %s366_s2 = inlined_call_operand.vmem [shape: f32[1,128], index: 2, kind: input, shape index: {}]   ;;  %s367_s3 = inlined_call_operand.vmem [shape: bf16[128,128], index: 3, kind: output, shape index: {}]  }
   0x1   :  { %v280_v0 = vld [vmem:[%s364_s0] sm:$0xff]   ;;  %v263_v3 = vcombine.low %v289_v2, %v289_v2  ;;  %v264_v4 = vcombine.high %v289_v2, %v289_v2 }
   0x2   :  { %v259_v1 = vld [vmem:[%s365_s1] ss:$0 sm:$0xff]  ;;  %v281_v5 = vunpack.c.l.bf16 %v280_v0  ;;  %v282_v6 = vunpack.c.h.bf16 %v280_v0 }
   0x3   :  { %v260_v7 = vld [vmem:[%s366_s2] ss:$0 sm:$0xff]  ;;  %241 = vst [vmem:[%s367_s3 + $0x8] sm:$0xf] %v263_v3  ;;  %243 = vst [vmem:[%s367_s3 + $0x10] sm:$0xf] %v263_v3 }
   0x4   :  { %245 = vst [vmem:[%s367_s3 + $0x18] sm:$0xf] %v263_v3  ;;  %247 = vst [vmem:[%s367_s3 + $0x20] sm:$0xf] %v263_v3  ;;  %v53_v8 = vmul.f32 %v281_v5, %v259_v1  ;;  %v54_v9 = vmul.f32 %v282_v6, %v259_v1 }
   0x5   :  { %249 = vst [vmem:[%s367_s3 + $0x28] sm:$0xf] %v263_v3  ;;  %251 = vst [vmem:[%s367_s3 + $0x30] sm:$0xf] %v263_v3 }
   0x6   :  { %253 = vst [vmem:[%s367_s3 + $0x38] sm:$0xf] %v263_v3  ;;  %242 = vst [vmem:[%s367_s3 + $0xc] sm:$0xf] %v264_v4  ;;  %v76_v10 = vadd.f32 %v260_v7, %v53_v8  ;;  %v77_v11 = vadd.f32 %v260_v7, %v54_v9 }
   0x7   :  { %244 = vst [vmem:[%s367_s3 + $0x14] sm:$0xf] %v264_v4  ;;  %246 = vst [vmem:[%s367_s3 + $0x1c] sm:$0xf] %v264_v4 }
   0x8   :  { %248 = vst [vmem:[%s367_s3 + $0x24] sm:$0xf] %v264_v4  ;;  %250 = vst [vmem:[%s367_s3 + $0x2c] sm:$0xf] %v264_v4  ;;  %v92_v12 = vmax.f32 %v76_v10, 0.0  ;;  %v93_v13 = vmax.f32 %v77_v11, 0.0 }
   0x9   :  { %252 = vst [vmem:[%s367_s3 + $0x34] sm:$0xf] %v264_v4  ;;  %254 = vst [vmem:[%s367_s3 + $0x3c] sm:$0xf] %v264_v4 }
   0xa   :  { %v286_v14 = vpack.c.bf16 %v93_v13, %v92_v12 }
   0xc   :  { %287 = vst [vmem:[%s367_s3] sm:$0xff] %v286_v14  }

// kernel: gcn_forward.7
= control target key start
LH: loop header
LB: loop body
LE: loop exit
PB: predicated region body
PF: predicated region fallthrough
CT: control target
= control target key end

     0   :  { %v716_v1 = vmov 0.0   ;;  %v717_v2 = vmov 0.0|0.0   ;;  %v376_v22 = vlaneseq  ;;  %s1023_s3 = inlined_call_operand.vmem [shape: bf16[128,128], index: 3, kind: input, shape index: {}]   ;;  %s1024_s5 = inlined_call_operand.vmem [shape: f32[128,128], index: 5, kind: output, shape index: {0}]   ;;  %s1025_s0 = inlined_call_operand.vmem [shape: bf16[128,128], index: 0, kind: input, shape index: {}]   ;;  %s1026_s1 = inlined_call_operand.vmem [shape: f32[1,128], index: 1, kind: input, shape index: {}]   ;;  %s1027_s2 = inlined_call_operand.vmem [shape: f32[1,128], index: 2, kind: input, shape index: {}]   ;;  %s1028_s4 = inlined_call_operand.vmem [shape: f32[1,128], index: 4, kind: input, shape index: {}]   ;;  %s1029_s6 = inlined_call_operand.vmem [shape: f32[128,128], index: 6, kind: output, shape index: {1}]  }
   0x1   :  { %v644_v0 = vld [vmem:[%s1023_s3] sm:$0xff]   ;;  %186 = vst [vmem:[%s1024_s5 + $0x10] sm:$0xff] %v716_v1  ;;  %187 = vst [vmem:[%s1024_s5 + $0x18] sm:$0xff] %v716_v1  ;;  %618 = vmatprep.mubr.bf16.mxu1 %v717_v2  ;;  %v645_v3 = vld [vmem:[%s1023_s3 + $0x8] sm:$0xff]  }
   0x2   :  { %188 = vst [vmem:[%s1024_s5 + $0x20] sm:$0xff] %v716_v1  ;;  %189 = vst [vmem:[%s1024_s5 + $0x28] sm:$0xff] %v716_v1  ;;  %594 = vmatprep.subr.bf16.mxu0 %v644_v0  ;;  %626 = vmatprep.subr.bf16.mxu1 %v644_v0  ;;  %v646_v4 = vld [vmem:[%s1023_s3 + $0x10] sm:$0xff]   ;;  %v647_v5 = vld [vmem:[%s1023_s3 + $0x18] sm:$0xff]   ;;  %v841_v23 = vand.u32 127, %v376_v22 }
   0x3   :  { %190 = vst [vmem:[%s1024_s5 + $0x30] sm:$0xff] %v716_v1  ;;  %191 = vst [vmem:[%s1024_s5 + $0x38] sm:$0xff] %v716_v1  ;;  %595 = vmatpush3.bf16.msra.mxu0 %v644_v0  ;;  %634 = vmatpush3.bf16.msra.mxu1 %v644_v0  ;;  %v575_v6 = vld [vmem:[%s1025_s0] sm:$0xff]   ;;  %v649_v18 = vld [vmem:[%s1023_s3 + $0x28] sm:$0xff]  }
   0x4   :  { %192 = vst [vmem:[%s1024_s5 + $0x40] sm:$0xff] %v716_v1  ;;  %193 = vst [vmem:[%s1024_s5 + $0x48] sm:$0xff] %v716_v1  ;;  %596 = vmatprep.subr.bf16.mxu0 %v645_v3  ;;  %627 = vmatprep.subr.bf16.mxu1 %v645_v3  ;;  %v563_v7 = vld [vmem:[%s1026_s1] ss:$0 sm:$0xff]  ;;  %v576_v8 = vunpack.c.l.bf16 %v575_v6  ;;  %v577_v9 = vunpack.c.h.bf16 %v575_v6  ;;  %v650_v20 = vld [vmem:[%s1023_s3 + $0x30] sm:$0xff]   ;;  %vm378_vm0 = vcmp.lt.s32.totalorder %v841_v23, 4 }
   0x5   :  { %194 = vst [vmem:[%s1024_s5 + $0x50] sm:$0xff] %v716_v1  ;;  %195 = vst [vmem:[%s1024_s5 + $0x58] sm:$0xff] %v716_v1  ;;  %v564_v10 = vld [vmem:[%s1027_s2] ss:$0 sm:$0xff]  ;;  %v651_v21 = vld [vmem:[%s1023_s3 + $0x38] sm:$0xff]  }
   0x6   :  { %196 = vst [vmem:[%s1024_s5 + $0x60] sm:$0xff] %v716_v1  ;;  %197 = vst [vmem:[%s1024_s5 + $0x68] sm:$0xff] %v716_v1  ;;  %v62_v11 = vmul.f32 %v576_v8, %v563_v7  ;;  %v63_v12 = vmul.f32 %v577_v9, %v563_v7  ;;  %v648_v13 = vld [vmem:[%s1023_s3 + $0x20] sm:$0xff]  }
   0x7   :  { %198 = vst [vmem:[%s1024_s5 + $0x70] sm:$0xff] %v716_v1  ;;  %199 = vst [vmem:[%s1024_s5 + $0x78] sm:$0xff] %v716_v1  ;;  %597 = vmatpush3.bf16.msra.mxu0 %v645_v3  ;;  %635 = vmatpush3.bf16.msra.mxu1 %v645_v3  ;;  %v565_v24 = vld [vmem:[%s1028_s4] ss:$0 sm:$0xff] }
   0x8   :  { %598 = vmatprep.subr.bf16.mxu0 %v646_v4  ;;  %628 = vmatprep.subr.bf16.mxu1 %v646_v4  ;;  %v85_v14 = vadd.f32 %v564_v10, %v62_v11  ;;  %v86_v15 = vadd.f32 %v564_v10, %v63_v12 }
   0xa   :  { %v101_v16 = vmax.f32 %v85_v14, 0.0  ;;  %v102_v17 = vmax.f32 %v86_v15, 0.0 }
   0xb   :  { %599 = vmatpush3.bf16.msra.mxu0 %v646_v4  ;;  %636 = vmatpush3.bf16.msra.mxu1 %v646_v4 }
   0xc   :  { %600 = vmatprep.subr.bf16.mxu0 %v647_v5  ;;  %629 = vmatprep.subr.bf16.mxu1 %v647_v5  ;;  %184 = vst [vmem:[%s1024_s5] sm:$0xff] %v101_v16  ;;  %185 = vst [vmem:[%s1024_s5 + $0x8] sm:$0xff] %v102_v17  ;;  %v200_v19 = vpack.c.bf16 %v102_v17, %v101_v16 }
   0xe   :  { %610 = vmatprep.mubr.bf16.mxu0 %v200_v19 }
   0xf   :  { %601 = vmatpush3.bf16.msra.mxu0 %v647_v5  ;;  %637 = vmatpush3.bf16.msra.mxu1 %v647_v5 }
  0x10   :  { %602 = vmatprep.subr.bf16.mxu0 %v648_v13  ;;  %630 = vmatprep.subr.bf16.mxu1 %v648_v13 }
  0x13   :  { %603 = vmatpush3.bf16.msra.mxu0 %v648_v13  ;;  %638 = vmatpush3.bf16.msra.mxu1 %v648_v13 }
  0x14   :  { %604 = vmatprep.subr.bf16.mxu0 %v649_v18  ;;  %631 = vmatprep.subr.bf16.mxu1 %v649_v18 }
  0x17   :  { %605 = vmatpush3.bf16.msra.mxu0 %v649_v18  ;;  %639 = vmatpush3.bf16.msra.mxu1 %v649_v18 }
  0x18   :  { %606 = vmatprep.subr.bf16.mxu0 %v650_v20  ;;  %632 = vmatprep.subr.bf16.mxu1 %v650_v20 }
  0x1b   :  { %607 = vmatpush3.bf16.msra.mxu0 %v650_v20  ;;  %640 = vmatpush3.bf16.msra.mxu1 %v650_v20 }
  0x1c   :  { %608 = vmatprep.subr.bf16.mxu0 %v651_v21  ;;  %633 = vmatprep.subr.bf16.mxu1 %v651_v21 }
  0x1f   :  { %609 = vmatpush3.bf16.msra.mxu0 %v651_v21  ;;  %641 = vmatpush3.bf16.msra.mxu1 %v651_v21 }
  0x22   :  { %611 = vmatmul.mubr.bf16.vlgmr.msra.gmra.mrb[0].mxu0 %v717_v2  ;;  %619 = vmatmul.mubr.bf16.vlgmr.msra.gmra.mrb[0].mxu1 %v717_v2 }
  0x23   :  { %614 = vmatprep.mubr.bf16.mxu0 %v717_v2  ;;  %622 = vmatprep.mubr.bf16.mxu1 %v717_v2 }
  0x2a   :  { %615 = vmatmul.mubr.bf16.gmra.mrb[4].mxu0 %v717_v2  ;;  %623 = vmatmul.mubr.bf16.gmra.mrb[4].mxu1 %v717_v2 }
  0xf5   :  { %v612_v25 = vpop.f32.mrb[0].mxu0  ;;  %v620_v26 = vpop.f32.mrb[0].mxu1 }
  0xf6   :  { %v322_v27 = vadd.f32 %v612_v25, %v565_v24  ;;  %v354_v28 = vadd.f32 %v620_v26, %v565_v24  ;;  %v313_v29 = vpop.f32.mrb[1].mxu0  ;;  %v345_v30 = vpop.f32.mrb[1].mxu1 }
  0xf7   :  { %v613_v31 = vpop.f32.mrb[2].mxu0  ;;  %v621_v32 = vpop.f32.mrb[2].mxu1  ;;  %v314_v33 = vadd.f32 %v565_v24, %v313_v29  ;;  %v346_v39 = vadd.f32 %v565_v24, %v345_v30 }
  0xf8   :  { %v325_v34 = vadd.f32 %v613_v31, %v565_v24  ;;  %v316_v35 = vpop.f32.mrb[3].mxu0  ;;  %v348_v36 = vpop.f32.mrb[3].mxu1  ;;  %v389_v37 = vsel %vm378_vm0, %v354_v28, -1e+30  ;;  %v381_v38 = vsel %vm378_vm0, %v322_v27, -1e+30  ;;  %v357_v40 = vadd.f32 %v621_v32, %v565_v24 }
  0xf9   :  { %415 = vmax.xlane.f32.xlu0 %v389_v37  ;;  %399 = vmax.xlane.f32.xlu1 %v381_v38  ;;  %v855_v42 = vsel %vm378_vm0, %v314_v33, -1e+30  ;;  %v317_v49 = vadd.f32 %v565_v24, %v316_v35  ;;  %v349_v50 = vadd.f32 %v565_v24, %v348_v36  ;;  %v387_v52 = vsel %vm378_vm0, %v346_v39, -1e+30 }
  0xfa   :  { %v382_v41 = vsel %vm378_vm0, %v325_v34, -1e+30  ;;  %v390_v51 = vsel %vm378_vm0, %v357_v40, -1e+30 }
  0xfb   :  { %v388_v57 = vsel %vm378_vm0, %v349_v50, -1e+30  ;;  %v380_v58 = vsel %vm378_vm0, %v317_v49, -1e+30 }
  0xfd   :  { %401 = vmax.xlane.f32.xlu1 %v382_v41  ;;  %395 = vmax.xlane.f32.xlu0 %v855_v42  ;;  %v616_v43 = vpop.f32.mrb[4].mxu0  ;;  %v624_v44 = vpop.f32.mrb[4].mxu1 }
  0xfe   :  { %v329_v45 = vpop.f32.mrb[5].mxu0  ;;  %v361_v46 = vpop.f32.mrb[5].mxu1  ;;  %v338_v55 = vadd.f32 %v616_v43, %v565_v24  ;;  %v370_v5 = vadd.f32 %v624_v44, %v565_v24 }
  0xff   :  { %v617_v47 = vpop.f32.mrb[6].mxu0  ;;  %v625_v48 = vpop.f32.mrb[6].mxu1  ;;  %v330_v61 = vadd.f32 %v565_v24, %v329_v45  ;;  %v362_v63 = vadd.f32 %v565_v24, %v361_v46 }
 0x100   :  { %v332_v53 = vpop.f32.mrb[7].mxu0  ;;  %v364_v54 = vpop.f32.mrb[7].mxu1  ;;  %v341_v56 = vadd.f32 %v617_v47, %v565_v24  ;;  %v385_v60 = vsel %vm378_vm0, %v338_v55, -1e+30  ;;  %v373_v6 = vadd.f32 %v625_v48, %v565_v24  ;;  %v899_v8 = vsel %vm378_vm0, %v370_v5, -1e+30 }
 0x101   :  { %417 = vmax.xlane.f32.xlu1 %v390_v51  ;;  %411 = vmax.xlane.f32.xlu0 %v387_v52  ;;  %v333_v62 = vadd.f32 %v565_v24, %v332_v53  ;;  %v365_v0 = vadd.f32 %v565_v24, %v364_v54  ;;  %v879_v2 = vsel %vm378_vm0, %v330_v61, -1e+30  ;;  %v889_v4 = vsel %vm378_vm0, %v362_v63, -1e+30 }
 0x102   :  { %v868_v59 = vsel %vm378_vm0, %v341_v56, -1e+30  ;;  %v895_v7 = vsel %vm378_vm0, %v373_v6, -1e+30 }
 0x103   :  { %v875_v1 = vsel %vm378_vm0, %v333_v62, -1e+30  ;;  %v885_v3 = vsel %vm378_vm0, %v365_v0, -1e+30 }
 0x105   :  { %413 = vmax.xlane.f32.xlu1 %v388_v57  ;;  %397 = vmax.xlane.f32.xlu0 %v380_v58 }
 0x109   :  { %409 = vmax.xlane.f32.xlu1 %v868_v59  ;;  %407 = vmax.xlane.f32.xlu0 %v385_v60 }
 0x10d   :  { %405 = vmax.xlane.f32.xlu1 %v875_v1  ;;  %403 = vmax.xlane.f32.xlu0 %v879_v2 }
 0x111   :  { %421 = vmax.xlane.f32.xlu1 %v885_v3  ;;  %419 = vmax.xlane.f32.xlu0 %v889_v4 }
 0x115   :  { %425 = vmax.xlane.f32.xlu1 %v895_v7  ;;  %423 = vmax.xlane.f32.xlu0 %v899_v8 }
 0x186   :  { %v416_v9 = vpop.xlane.xlu0 %415  ;;  %v400_v10 = vpop.xlane.xlu1 %399 }
 0x187   :  { %v429_v11 = vsub.f32 %v381_v38, %v400_v10  ;;  %v437_v12 = vsub.f32 %v389_v37, %v416_v9 }
 0x189   :  { %v447_v13 = vmul.f32 1.442695, %v429_v11  ;;  %v463_v17 = vmul.f32 1.442695, %v437_v12 }
 0x18a   :  { %v402_v14 = vpop.xlane.xlu1 %401  ;;  %v396_v15 = vpop.xlane.xlu0 %395 }
 0x18b   :  { %v430_v16 = vsub.f32 %v382_v41, %v402_v14  ;;  %652 = vpow2.f32 %v447_v13  ;;  %v427_v18 = vsub.f32 %v855_v42, %v396_v15 }
 0x18d   :  { %v449_v19 = vmul.f32 1.442695, %v430_v16  ;;  %v443_v24 = vmul.f32 1.442695, %v427_v18 }
 0x18e   :  { %v418_v20 = vpop.xlane.xlu1 %417  ;;  %v412_v21 = vpop.xlane.xlu0 %411 }
 0x18f   :  { %654 = vpow2.f32 %v449_v19  ;;  %v438_v22 = vsub.f32 %v390_v51, %v418_v20  ;;  %v435_v23 = vsub.f32 %v387_v52, %v412_v21 }
 0x190   :  { %656 = vpow2.f32 %v463_v17 }
 0x191   :  { %v465_v25 = vmul.f32 1.442695, %v438_v22  ;;  %v459_v28 = vmul.f32 1.442695, %v435_v23 }
 0x192   :  { %v414_v26 = vpop.xlane.xlu1 %413  ;;  %v398_v27 = vpop.xlane.xlu0 %397 }
 0x193   :  { %658 = vpow2.f32 %v465_v25  ;;  %v436_v29 = vsub.f32 %v388_v57, %v414_v26  ;;  %v428_v30 = vsub.f32 %v380_v58, %v398_v27 }
 0x194   :  { %660 = vpow2.f32 %v443_v24 }
 0x195   :  { %v445_v31 = vmul.f32 1.442695, %v428_v30  ;;  %v904_v32 = vpop.eup %652  ;;  %662 = vpow2.f32 %v459_v28  ;;  %v461_v35 = vmul.f32 1.442695, %v436_v29 }
 0x196   :  { %v410_v33 = vpop.xlane.xlu1 %409  ;;  %v408_v34 = vpop.xlane.xlu0 %407  ;;  %479 = vadd.xlane.f32.xlu0 %v904_v32 }
 0x197   :  { %v434_v36 = vsub.f32 %v868_v59, %v410_v33  ;;  %v433_v37 = vsub.f32 %v385_v60, %v408_v34  ;;  %664 = vpow2.f32 %v445_v31 }
 0x198   :  { %666 = vpow2.f32 %v461_v35 }
 0x199   :  { %v908_v38 = vpop.eup %654  ;;  %v455_v39 = vmul.f32 1.442695, %v433_v37  ;;  %v457_v43 = vmul.f32 1.442695, %v434_v36 }
 0x19a   :  { %v910_v40 = vpop.eup %656  ;;  %481 = vadd.xlane.f32.xlu1 %v908_v38  ;;  %v406_v41 = vpop.xlane.xlu1 %405 }
 0x19b   :  { %v404_v42 = vpop.xlane.xlu0 %403  ;;  %v432_v44 = vsub.f32 %v875_v1, %v406_v41  ;;  %495 = vadd.xlane.f32.xlu0 %v910_v40  ;;  %668 = vpow2.f32 %v455_v39 }
 0x19c   :  { %v431_v45 = vsub.f32 %v879_v2, %v404_v42  ;;  %670 = vpow2.f32 %v457_v43 }
 0x19d   :  { %v916_v46 = vpop.eup %658  ;;  %v453_v51 = vmul.f32 1.442695, %v432_v44 }
 0x19e   :  { %v451_v47 = vmul.f32 1.442695, %v431_v45  ;;  %v918_v48 = vpop.eup %660  ;;  %497 = vadd.xlane.f32.xlu1 %v916_v46  ;;  %v422_v49 = vpop.xlane.xlu1 %421 }
 0x19f   :  { %v420_v50 = vpop.xlane.xlu0 %419  ;;  %v440_v52 = vsub.f32 %v885_v3, %v422_v49  ;;  %475 = vadd.xlane.f32.xlu0 %v918_v48  ;;  %v924_v54 = vpop.eup %662 }
 0x1a0   :  { %v439_v53 = vsub.f32 %v889_v4, %v420_v50  ;;  %672 = vpow2.f32 %v451_v47 }
 0x1a1   :  { %v926_v56 = vpop.eup %664  ;;  %674 = vpow2.f32 %v453_v51  ;;  %v469_v59 = vmul.f32 1.442695, %v440_v52 }
 0x1a2   :  { %v467_v55 = vmul.f32 1.442695, %v439_v53  ;;  %v426_v57 = vpop.xlane.xlu1 %425  ;;  %477 = vadd.xlane.f32.xlu1 %v926_v56  ;;  %v932_v62 = vpop.eup %666 }
 0x1a3   :  { %v424_v58 = vpop.xlane.xlu0 %423  ;;  %491 = vadd.xlane.f32.xlu0 %v924_v54  ;;  %v442_v61 = vsub.f32 %v895_v7, %v426_v57 }
 0x1a4   :  { %v441_v60 = vsub.f32 %v899_v8, %v424_v58  ;;  %676 = vpow2.f32 %v467_v55 }
 0x1a5   :  { %v934_v0 = vpop.eup %668  ;;  %678 = vpow2.f32 %v469_v59  ;;  %v473_v1 = vmul.f32 1.442695, %v442_v61 }
 0x1a6   :  { %v471_v63 = vmul.f32 1.442695, %v441_v60  ;;  %493 = vadd.xlane.f32.xlu1 %v932_v62  ;;  %v938_v2 = vpop.eup %670 }
 0x1a7   :  { %487 = vadd.xlane.f32.xlu0 %v934_v0 }
 0x1a8   :  { %680 = vpow2.f32 %v471_v63 }
 0x1a9   :  { %682 = vpow2.f32 %v473_v1 }
 0x1aa   :  { %v940_v3 = vpop.eup %672  ;;  %489 = vadd.xlane.f32.xlu1 %v938_v2 }
 0x1ab   :  { %483 = vadd.xlane.f32.xlu0 %v940_v3  ;;  %v944_v4 = vpop.eup %674 }
 0x1ae   :  { %v946_v5 = vpop.eup %676  ;;  %485 = vadd.xlane.f32.xlu1 %v944_v4 }
 0x1af   :  { %499 = vadd.xlane.f32.xlu0 %v946_v5  ;;  %v950_v6 = vpop.eup %678 }
 0x1b2   :  { %v952_v7 = vpop.eup %680  ;;  %501 = vadd.xlane.f32.xlu1 %v950_v6 }
 0x1b3   :  { %503 = vadd.xlane.f32.xlu0 %v952_v7  ;;  %v956_v8 = vpop.eup %682 }
 0x1b6   :  { %505 = vadd.xlane.f32.xlu1 %v956_v8 }
 0x223   :  { %v480_v9 = vpop.xlane.xlu0 %479 }
 0x224   :  { %684 = vrcp.f32 %v480_v9 }
 0x227   :  { %v482_v10 = vpop.xlane.xlu1 %481 }
 0x228   :  { %686 = vrcp.f32 %v482_v10  ;;  %v496_v11 = vpop.xlane.xlu0 %495 }
 0x229   :  { %688 = vrcp.f32 %v496_v11 }
 0x22b   :  { %v498_v12 = vpop.xlane.xlu1 %497 }
 0x22c   :  { %690 = vrcp.f32 %v498_v12  ;;  %v476_v13 = vpop.xlane.xlu0 %475 }
 0x22d   :  { %692 = vrcp.f32 %v476_v13 }
 0x22e   :  { %v685_v14 = vpop.eup %684 }
 0x22f   :  { %v512_v15 = vmul.f32 %v685_v14, %v904_v32  ;;  %v478_v16 = vpop.xlane.xlu1 %477 }
 0x230   :  { %v492_v17 = vpop.xlane.xlu0 %491  ;;  %694 = vrcp.f32 %v478_v16 }
 0x231   :  { %541 = vst [vmem:[%s1029_s6 + $0x10] sm:$0xff] %v512_v15  ;;  %696 = vrcp.f32 %v492_v17 }
 0x232   :  { %v687_v18 = vpop.eup %686 }
 0x233   :  { %v689_v19 = vpop.eup %688  ;;  %v514_v20 = vmul.f32 %v687_v18, %v908_v38  ;;  %v494_v22 = vpop.xlane.xlu1 %493 }
 0x234   :  { %v528_v21 = vmul.f32 %v689_v19, %v910_v40  ;;  %v488_v23 = vpop.xlane.xlu0 %487  ;;  %698 = vrcp.f32 %v494_v22 }
 0x235   :  { %542 = vst [vmem:[%s1029_s6 + $0x18] sm:$0xff] %v514_v20  ;;  %700 = vrcp.f32 %v488_v23 }
 0x236   :  { %v691_v24 = vpop.eup %690  ;;  %549 = vst [vmem:[%s1029_s6 + $0x50] sm:$0xff] %v528_v21 }
 0x237   :  { %v693_v25 = vpop.eup %692  ;;  %v530_v26 = vmul.f32 %v691_v24, %v916_v46  ;;  %v490_v28 = vpop.xlane.xlu1 %489 }
 0x238   :  { %v508_v27 = vmul.f32 %v693_v25, %v918_v48  ;;  %v484_v29 = vpop.xlane.xlu0 %483  ;;  %702 = vrcp.f32 %v490_v28 }
 0x239   :  { %550 = vst [vmem:[%s1029_s6 + $0x58] sm:$0xff] %v530_v26  ;;  %704 = vrcp.f32 %v484_v29 }
 0x23a   :  { %539 = vst [vmem:[%s1029_s6] sm:$0xff] %v508_v27  ;;  %v695_v30 = vpop.eup %694 }
 0x23b   :  { %v697_v31 = vpop.eup %696  ;;  %v510_v32 = vmul.f32 %v695_v30, %v926_v56  ;;  %v486_v33 = vpop.xlane.xlu1 %485 }
 0x23c   :  { %v500_v34 = vpop.xlane.xlu0 %499  ;;  %v524_v35 = vmul.f32 %v697_v31, %v924_v54  ;;  %706 = vrcp.f32 %v486_v33 }
 0x23d   :  { %540 = vst [vmem:[%s1029_s6 + $0x8] sm:$0xff] %v510_v32  ;;  %708 = vrcp.f32 %v500_v34 }
 0x23e   :  { %v699_v36 = vpop.eup %698  ;;  %547 = vst [vmem:[%s1029_s6 + $0x40] sm:$0xff] %v524_v35 }
 0x23f   :  { %v701_v37 = vpop.eup %700  ;;  %v526_v38 = vmul.f32 %v699_v36, %v932_v62  ;;  %v502_v39 = vpop.xlane.xlu1 %501 }
 0x240   :  { %v504_v40 = vpop.xlane.xlu0 %503  ;;  %v520_v41 = vmul.f32 %v701_v37, %v934_v0  ;;  %710 = vrcp.f32 %v502_v39 }
 0x241   :  { %548 = vst [vmem:[%s1029_s6 + $0x48] sm:$0xff] %v526_v38  ;;  %712 = vrcp.f32 %v504_v40 }
 0x242   :  { %v703_v42 = vpop.eup %702  ;;  %545 = vst [vmem:[%s1029_s6 + $0x30] sm:$0xff] %v520_v41 }
 0x243   :  { %v705_v43 = vpop.eup %704  ;;  %v522_v44 = vmul.f32 %v703_v42, %v938_v2  ;;  %v506_v45 = vpop.xlane.xlu1 %505 }
 0x244   :  { %v516_v46 = vmul.f32 %v705_v43, %v940_v3  ;;  %714 = vrcp.f32 %v506_v45 }
 0x245   :  { %546 = vst [vmem:[%s1029_s6 + $0x38] sm:$0xff] %v522_v44 }
 0x246   :  { %v707_v47 = vpop.eup %706  ;;  %543 = vst [vmem:[%s1029_s6 + $0x20] sm:$0xff] %v516_v46 }
 0x247   :  { %v709_v48 = vpop.eup %708  ;;  %v518_v49 = vmul.f32 %v707_v47, %v944_v4 }
 0x248   :  { %v532_v50 = vmul.f32 %v709_v48, %v946_v5 }
 0x249   :  { %544 = vst [vmem:[%s1029_s6 + $0x28] sm:$0xff] %v518_v49 }
 0x24a   :  { %v711_v51 = vpop.eup %710  ;;  %551 = vst [vmem:[%s1029_s6 + $0x60] sm:$0xff] %v532_v50 }
 0x24b   :  { %v713_v52 = vpop.eup %712  ;;  %v534_v53 = vmul.f32 %v711_v51, %v950_v6 }
 0x24c   :  { %v536_v54 = vmul.f32 %v713_v52, %v952_v7 }
 0x24d   :  { %552 = vst [vmem:[%s1029_s6 + $0x68] sm:$0xff] %v534_v53 }
 0x24e   :  { %v715_v55 = vpop.eup %714  ;;  %553 = vst [vmem:[%s1029_s6 + $0x70] sm:$0xff] %v536_v54 }
 0x24f   :  { %v538_v56 = vmul.f32 %v715_v55, %v956_v8 }
 0x251   :  { %554 = vst [vmem:[%s1029_s6 + $0x78] sm:$0xff] %v538_v56 }

// kernel: gcn_forward.4
= control target key start
LH: loop header
LB: loop body
LE: loop exit
PB: predicated region body
PF: predicated region fallthrough
CT: control target
= control target key end

     0   :  { %v1274_v1 = vmov 0   ;;  %s1516_s1 = inlined_call_operand.vmem [shape: bf16[128,128], index: 1, kind: input, shape index: {}, may-alias: {1,2}]   ;;  %s1517_s0 = inlined_call_operand.vmem [shape: s8[128,128], index: 0, kind: input, shape index: {}]   ;;  %s1518_s3 = inlined_call_operand.vmem [shape: f32[128,1], index: 3, kind: input, shape index: {}]   ;;  %s1519_s5 = inlined_call_operand.vmem [shape: bf16[128,128], index: 5, kind: input, shape index: {}]   ;;  %s1520_s4 = inlined_call_operand.vmem [shape: bf16[128,128], index: 4, kind: input, shape index: {}]   ;;  %s1521_s2 = inlined_call_operand.vmem [shape: bf16[128,128], index: 2, kind: input, shape index: {}, may-alias: {1,2}]   ;;  %s1522_s6 = inlined_call_operand.vmem [shape: bf16[128,128], index: 6, kind: output, shape index: {0}]   ;;  %s1523_s7 = inlined_call_operand.vmem [shape: f32[8,128], index: 7, kind: output, shape index: {1}]   ;;  %s1524_s8 = inlined_call_operand.vmem [shape: f32[8,128], index: 8, kind: output, shape index: {2}]  }
   0x1   :  { %v1242_v0 = vld [vmem:[%s1516_s1] sm:$0xff]   ;;  %1240 = vset.pattern.permute.xlu0 %v1274_v1  ;;  %1241 = vset.pattern.permute.xlu1 %v1274_v1  ;;  %v1243_v2 = vld [vmem:[%s1516_s1 + $0x8] sm:$0xff]   ;;  %v1244_v3 = vld [vmem:[%s1516_s1 + $0x10] sm:$0xff]  }
   0x2   :  { %1111 = vmatprep.subr.bf16.mxu0 %v1242_v0  ;;  %v1245_v4 = vld [vmem:[%s1516_s1 + $0x18] sm:$0xff]   ;;  %v1335_v5 = vld [vmem:[%s1517_s0] sm:$0xff]  ;;  %v294_v8 = vld [vmem:[%s1518_s3 + $0x10] sm:$0xff] }
   0x3   :  { %1112 = vmatpush3.bf16.msra.mxu0 %v1242_v0  ;;  %v51_v6 = vunpack.c.l.s8.bf16 %v1335_v5  ;;  %v292_v7 = vld [vmem:[%s1518_s3] sm:$0xff]  ;;  %320 = vperm.xlu1 %1241, %v294_v8   ;;  %v293_v9 = vld [vmem:[%s1518_s3 + $0x8] sm:$0xff]  ;;  %v295_v10 = vld [vmem:[%s1518_s3 + $0x18] sm:$0xff]  ;;  %v52_v31 = vunpack.c.h.s8.bf16 %v1335_v5 }
   0x4   :  { %1113 = vmatprep.subr.bf16.mxu0 %v1243_v2  ;;  %310 = vperm.xlu0 %1240, %v292_v7   ;;  %v1246_v11 = vld [vmem:[%s1516_s1 + $0x20] sm:$0xff]   ;;  %v1247_v12 = vld [vmem:[%s1516_s1 + $0x28] sm:$0xff]   ;;  %v1248_v17 = vld [vmem:[%s1516_s1 + $0x30] sm:$0xff]  }
   0x5   :  { %1127 = vmatprep.mubr.bf16.mxu0 %v51_v6  ;;  %v296_v13 = vld [vmem:[%s1518_s3 + $0x20] sm:$0xff]  ;;  %v297_v14 = vld [vmem:[%s1518_s3 + $0x28] sm:$0xff]  ;;  %v298_v18 = vld [vmem:[%s1518_s3 + $0x30] sm:$0xff] }
   0x6   :  { %v1250_v15 = vld [vmem:[%s1519_s5] sm:$0xff]   ;;  %v1251_v16 = vld [vmem:[%s1519_s5 + $0x8] sm:$0xff]   ;;  %v299_v19 = vld [vmem:[%s1518_s3 + $0x38] sm:$0xff] }
   0x7   :  { %1114 = vmatpush3.bf16.msra.mxu0 %v1243_v2  ;;  %325 = vperm.xlu1 %1241, %v295_v10   ;;  %v1252_v20 = vld [vmem:[%s1519_s5 + $0x10] sm:$0xff]   ;;  %v1249_v21 = vld [vmem:[%s1516_s1 + $0x38] sm:$0xff]   ;;  %v300_v22 = vld [vmem:[%s1518_s3 + $0x40] sm:$0xff] }
   0x8   :  { %1115 = vmatprep.subr.bf16.mxu0 %v1244_v3  ;;  %315 = vperm.xlu0 %1240, %v293_v9   ;;  %v301_v23 = vld [vmem:[%s1518_s3 + $0x48] sm:$0xff]  ;;  %v1253_v24 = vld [vmem:[%s1519_s5 + $0x18] sm:$0xff]   ;;  %v302_v25 = vld [vmem:[%s1518_s3 + $0x50] sm:$0xff] }
   0x9   :  { %1143 = vmatprep.subr.bf16.mxu1 %v1250_v15  ;;  %v303_v26 = vld [vmem:[%s1518_s3 + $0x58] sm:$0xff]  ;;  %v48_v27 = vld [vmem:[%s1517_s0 + $0x8] sm:$0xff]  ;;  %v1254_v28 = vld [vmem:[%s1519_s5 + $0x20] sm:$0xff]  }
   0xa   :  { %1144 = vmatpush3.bf16.msra.mxu1 %v1250_v15  ;;  %v1407_v29 = vld [vmem:[%s1520_s4] sm:$0xff]   ;;  %v305_v32 = vld [vmem:[%s1518_s3 + $0x68] sm:$0xff]  ;;  %v53_v34 = vunpack.c.l.s8.bf16 %v48_v27  ;;  %v306_v37 = vld [vmem:[%s1518_s3 + $0x70] sm:$0xff]  ;;  %v54_v42 = vunpack.c.h.s8.bf16 %v48_v27 }
   0xb   :  { %1116 = vmatpush3.bf16.msra.mxu0 %v1244_v3  ;;  %335 = vperm.xlu1 %1241, %v297_v14   ;;  %v304_v30 = vld [vmem:[%s1518_s3 + $0x60] sm:$0xff]  ;;  %v1256_v35 = vld [vmem:[%s1519_s5 + $0x28] sm:$0xff]   ;;  %v49_v38 = vld [vmem:[%s1517_s0 + $0x10] sm:$0xff] }
   0xc   :  { %1117 = vmatprep.subr.bf16.mxu0 %v1245_v4  ;;  %330 = vperm.xlu0 %1240, %v296_v13   ;;  %v1262_v33 = vld [vmem:[%s1521_s2] sm:$0xff]   ;;  %v1257_v36 = vld [vmem:[%s1520_s4 + $0x8] sm:$0xff]   ;;  %v307_v39 = vld [vmem:[%s1518_s3 + $0x78] sm:$0xff]  ;;  %v55_v43 = vunpack.c.l.s8.bf16 %v49_v38  ;;  %v56_v48 = vunpack.c.h.s8.bf16 %v49_v38 }
   0xd   :  { %1145 = vmatprep.subr.bf16.mxu1 %v1251_v16  ;;  %1159 = vmatprep.mubr.bf16.mxu1 %v1262_v33  ;;  %v1258_v40 = vld [vmem:[%s1519_s5 + $0x30] sm:$0xff]   ;;  %v1260_v44 = vld [vmem:[%s1519_s5 + $0x38] sm:$0xff]   ;;  %v1264_v47 = vld [vmem:[%s1520_s4 + $0x20] sm:$0xff]  }
   0xe   :  { %1146 = vmatpush3.bf16.msra.mxu1 %v1251_v16  ;;  %v1259_v41 = vld [vmem:[%s1520_s4 + $0x10] sm:$0xff]   ;;  %v1261_v45 = vld [vmem:[%s1520_s4 + $0x18] sm:$0xff]   ;;  %v1263_v50 = vld [vmem:[%s1521_s2 + $0x8] sm:$0xff]  }
   0xf   :  { %1118 = vmatpush3.bf16.msra.mxu0 %v1245_v4  ;;  %345 = vperm.xlu1 %1241, %v299_v19   ;;  %v50_v46 = vld [vmem:[%s1517_s0 + $0x18] sm:$0xff]  ;;  %v1265_v51 = vld [vmem:[%s1520_s4 + $0x28] sm:$0xff]   ;;  %v1266_v52 = vld [vmem:[%s1521_s2 + $0x10] sm:$0xff]  }
  0x10   :  { %1119 = vmatprep.subr.bf16.mxu0 %v1246_v11  ;;  %340 = vperm.xlu0 %1240, %v298_v18   ;;  %v57_v49 = vunpack.c.l.s8.bf16 %v50_v46  ;;  %v58_v53 = vunpack.c.h.s8.bf16 %v50_v46  ;;  %v1267_v54 = vld [vmem:[%s1521_s2 + $0x18] sm:$0xff]   ;;  %v1268_v55 = vld [vmem:[%s1520_s4 + $0x30] sm:$0xff]   ;;  %v1270_v57 = vld [vmem:[%s1521_s2 + $0x20] sm:$0xff]  }
  0x11   :  { %1147 = vmatprep.subr.bf16.mxu1 %v1252_v20  ;;  %v1269_v56 = vld [vmem:[%s1520_s4 + $0x38] sm:$0xff]   ;;  %v1271_v58 = vld [vmem:[%s1521_s2 + $0x28] sm:$0xff]   ;;  %v1272_v59 = vld [vmem:[%s1521_s2 + $0x30] sm:$0xff]  }
  0x12   :  { %1148 = vmatpush3.bf16.msra.mxu1 %v1252_v20  ;;  %v1273_v60 = vld [vmem:[%s1521_s2 + $0x38] sm:$0xff]  }
  0x13   :  { %1120 = vmatpush3.bf16.msra.mxu0 %v1246_v11  ;;  %355 = vperm.xlu1 %1241, %v301_v23  }
  0x14   :  { %1121 = vmatprep.subr.bf16.mxu0 %v1247_v12  ;;  %350 = vperm.xlu0 %1240, %v300_v22  }
  0x15   :  { %1149 = vmatprep.subr.bf16.mxu1 %v1253_v24 }
  0x16   :  { %1150 = vmatpush3.bf16.msra.mxu1 %v1253_v24 }
  0x17   :  { %1122 = vmatpush3.bf16.msra.mxu0 %v1247_v12  ;;  %365 = vperm.xlu1 %1241, %v303_v26  }
  0x18   :  { %1123 = vmatprep.subr.bf16.mxu0 %v1248_v17  ;;  %360 = vperm.xlu0 %1240, %v302_v25  }
  0x19   :  { %1151 = vmatprep.subr.bf16.mxu1 %v1254_v28 }
  0x1a   :  { %1152 = vmatpush3.bf16.msra.mxu1 %v1254_v28 }
  0x1b   :  { %1124 = vmatpush3.bf16.msra.mxu0 %v1248_v17  ;;  %375 = vperm.xlu1 %1241, %v305_v32  }
  0x1c   :  { %1125 = vmatprep.subr.bf16.mxu0 %v1249_v21  ;;  %370 = vperm.xlu0 %1240, %v304_v30  }
  0x1d   :  { %1153 = vmatprep.subr.bf16.mxu1 %v1256_v35 }
  0x1e   :  { %1154 = vmatpush3.bf16.msra.mxu1 %v1256_v35 }
  0x1f   :  { %1126 = vmatpush3.bf16.msra.mxu0 %v1249_v21  ;;  %385 = vperm.xlu1 %1241, %v307_v39  }
  0x20   :  { %1175 = vmatprep.subr.bf16.mxu0 %v1407_v29  ;;  %380 = vperm.xlu0 %1240, %v306_v37  }
  0x21   :  { %1155 = vmatprep.subr.bf16.mxu1 %v1258_v40 }
  0x22   :  { %1128 = vmatmul.mubr.bf16.vlgmr.msra.gmra.mrb[0].mxu0 %v52_v31  ;;  %1156 = vmatpush3.bf16.msra.mxu1 %v1258_v40 }
  0x23   :  { %1131 = vmatprep.mubr.bf16.mxu0 %v53_v34  ;;  %1176 = vmatpush3.bf16.msra.mxu0 %v1407_v29 }
  0x24   :  { %1177 = vmatprep.subr.bf16.mxu0 %v1257_v36  ;;  %1157 = vmatprep.subr.bf16.mxu1 %v1260_v44 }
  0x26   :  { %1158 = vmatpush3.bf16.msra.mxu1 %v1260_v44 }
  0x27   :  { %1178 = vmatpush3.bf16.msra.mxu0 %v1257_v36  ;;  %1207 = vmatprep.subr.bf16.mxu1 %v1407_v29 }
  0x28   :  { %1179 = vmatprep.subr.bf16.mxu0 %v1259_v41 }
  0x29   :  { %1160 = vmatmul.mubr.bf16.vlgmr.msra.gmra.mrb[0].mxu1 %v1263_v50 }
  0x2a   :  { %1132 = vmatmul.mubr.bf16.gmra.mrb[4].mxu0 %v54_v42  ;;  %1215 = vmatpush3.bf16.msra.mxu1 %v1407_v29 }
  0x2b   :  { %1135 = vmatprep.mubr.bf16.mxu0 %v55_v43  ;;  %1180 = vmatpush3.bf16.msra.mxu0 %v1259_v41 }
  0x2c   :  { %1181 = vmatprep.subr.bf16.mxu0 %v1261_v45  ;;  %1208 = vmatprep.subr.bf16.mxu1 %v1257_v36 }
  0x2d   :  { %1163 = vmatprep.mubr.bf16.mxu1 %v1266_v52 }
  0x2e   :  { %1216 = vmatpush3.bf16.msra.mxu1 %v1257_v36 }
  0x2f   :  { %1182 = vmatpush3.bf16.msra.mxu0 %v1261_v45  ;;  %1209 = vmatprep.subr.bf16.mxu1 %v1259_v41 }
  0x30   :  { %1183 = vmatprep.subr.bf16.mxu0 %v1264_v47 }
  0x31   :  { %1164 = vmatmul.mubr.bf16.gmra.mrb[4].mxu1 %v1267_v54 }
  0x32   :  { %1136 = vmatmul.mubr.bf16.gmra.mrb[8].mxu0 %v56_v48  ;;  %1217 = vmatpush3.bf16.msra.mxu1 %v1259_v41 }
  0x33   :  { %1139 = vmatprep.mubr.bf16.mxu0 %v57_v49  ;;  %1184 = vmatpush3.bf16.msra.mxu0 %v1264_v47 }
  0x34   :  { %1185 = vmatprep.subr.bf16.mxu0 %v1265_v51  ;;  %1210 = vmatprep.subr.bf16.mxu1 %v1261_v45 }
  0x35   :  { %1167 = vmatprep.mubr.bf16.mxu1 %v1270_v57 }
  0x36   :  { %1218 = vmatpush3.bf16.msra.mxu1 %v1261_v45 }
  0x37   :  { %1186 = vmatpush3.bf16.msra.mxu0 %v1265_v51  ;;  %1211 = vmatprep.subr.bf16.mxu1 %v1264_v47 }
  0x38   :  { %1187 = vmatprep.subr.bf16.mxu0 %v1268_v55 }
  0x39   :  { %1168 = vmatmul.mubr.bf16.gmra.mrb[8].mxu1 %v1271_v58 }
  0x3a   :  { %1140 = vmatmul.mubr.bf16.gmra.mrb[12].mxu0 %v58_v53  ;;  %1219 = vmatpush3.bf16.msra.mxu1 %v1264_v47 }
  0x3b   :  { %1212 = vmatprep.subr.bf16.mxu1 %v1265_v51  ;;  %1188 = vmatpush3.bf16.msra.mxu0 %v1268_v55 }
  0x3c   :  { %1189 = vmatprep.subr.bf16.mxu0 %v1269_v56  ;;  %1171 = vmatprep.mubr.bf16.mxu1 %v1272_v59 }
  0x3e   :  { %1220 = vmatpush3.bf16.msra.mxu1 %v1265_v51 }
  0x3f   :  { %1213 = vmatprep.subr.bf16.mxu1 %v1268_v55  ;;  %1190 = vmatpush3.bf16.msra.mxu0 %v1269_v56 }
  0x41   :  { %1172 = vmatmul.mubr.bf16.gmra.mrb[12].mxu1 %v1273_v60 }
  0x42   :  { %1221 = vmatpush3.bf16.msra.mxu1 %v1268_v55 }
  0x43   :  { %1214 = vmatprep.subr.bf16.mxu1 %v1269_v56 }
  0x46   :  { %1222 = vmatpush3.bf16.msra.mxu1 %v1269_v56 }
  0x82   :  { %v321_v62 = vpop.permute.xlu1 %320 }
  0x83   :  { %v311_v61 = vpop.permute.xlu0 %310 }
  0x86   :  { %v326_v0 = vpop.permute.xlu1 %325 }
  0x87   :  { %v316_v63 = vpop.permute.xlu0 %315 }
  0x8a   :  { %v336_v2 = vpop.permute.xlu1 %335 }
  0x8b   :  { %v331_v1 = vpop.permute.xlu0 %330 }
  0x8e   :  { %v346_v6 = vpop.permute.xlu1 %345 }
  0x8f   :  { %v341_v3 = vpop.permute.xlu0 %340 }
  0x92   :  { %v356_v16 = vpop.permute.xlu1 %355 }
  0x93   :  { %v351_v11 = vpop.permute.xlu0 %350 }
  0x96   :  { %v366_v27 = vpop.permute.xlu1 %365 }
  0x97   :  { %v361_v19 = vpop.permute.xlu0 %360 }
  0x9a   :  { %v376_v39 = vpop.permute.xlu1 %375 }
  0x9b   :  { %v371_v29 = vpop.permute.xlu0 %370 }
  0x9e   :  { %v386_v48 = vpop.permute.xlu1 %385 }
  0x9f   :  { %v381_v46 = vpop.permute.xlu0 %380 }
  0xf5   :  { %v1129_v4 = vpop.f32.mrb[0].mxu0 }
  0xf6   :  { %v178_v5 = vpop.f32.mrb[1].mxu0  ;;  %v390_v8 = vmul.f32 %v1129_v4, %v321_v62 }
  0xf7   :  { %v1130_v7 = vpop.f32.mrb[2].mxu0  ;;  %v388_v12 = vmul.f32 %v311_v61, %v178_v5 }
  0xf8   :  { %v391_v9 = vmul.f32 %v1130_v7, %v326_v0  ;;  %v181_v10 = vpop.f32.mrb[3].mxu0 }
  0xf9   :  { %v389_v13 = vmul.f32 %v316_v63, %v181_v10 }
  0xfa   :  { %v405_v14 = vpack.c.bf16 %v391_v9, %v390_v8 }
  0xfb   :  { %v404_v15 = vpack.c.bf16 %v389_v13, %v388_v12 }
  0xfc   :  { %v1161_v32 = vpop.f32.mrb[0].mxu1 }
  0xfd   :  { %v1133_v17 = vpop.f32.mrb[4].mxu0  ;;  %1191 = vmatprep.mubr.bf16.mxu0 %v404_v15  ;;  %v590_v34 = vpop.f32.mrb[1].mxu1 }
  0xfe   :  { %v194_v18 = vpop.f32.mrb[5].mxu0  ;;  %1192 = vmatmul.mubr.bf16.vlgmr.msra.gmra.mrb[16].mxu0 %v405_v14  ;;  %v394_v21 = vmul.f32 %v1133_v17, %v341_v3  ;;  %v1162_v38 = vpop.f32.mrb[2].mxu1 }
  0xff   :  { %v1134_v20 = vpop.f32.mrb[6].mxu0  ;;  %v392_v24 = vmul.f32 %v331_v1, %v194_v18  ;;  %v593_v42 = vpop.f32.mrb[3].mxu1 }
 0x100   :  { %v395_v22 = vmul.f32 %v1134_v20, %v346_v6  ;;  %v197_v23 = vpop.f32.mrb[7].mxu0 }
 0x101   :  { %v393_v25 = vmul.f32 %v336_v2, %v197_v23 }
 0x102   :  { %v407_v26 = vpack.c.bf16 %v395_v22, %v394_v21 }
 0x103   :  { %v406_v28 = vpack.c.bf16 %v393_v25, %v392_v24 }
 0x104   :  { %v1165_v57 = vpop.f32.mrb[4].mxu1 }
 0x105   :  { %v1137_v30 = vpop.f32.mrb[8].mxu0  ;;  %1195 = vmatprep.mubr.bf16.mxu0 %v406_v28  ;;  %v606_v58 = vpop.f32.mrb[5].mxu1 }
 0x106   :  { %v210_v31 = vpop.f32.mrb[9].mxu0  ;;  %1196 = vmatmul.mubr.bf16.gmra.mrb[20].mxu0 %v407_v26  ;;  %v398_v35 = vmul.f32 %v1137_v30, %v361_v19  ;;  %v1166_v59 = vpop.f32.mrb[6].mxu1 }
 0x107   :  { %v1138_v33 = vpop.f32.mrb[10].mxu0  ;;  %v396_v40 = vmul.f32 %v351_v11, %v210_v31  ;;  %v609_v60 = vpop.f32.mrb[7].mxu1 }
 0x108   :  { %v399_v36 = vmul.f32 %v1138_v33, %v366_v27  ;;  %v213_v37 = vpop.f32.mrb[11].mxu0 }
 0x109   :  { %v397_v41 = vmul.f32 %v356_v16, %v213_v37 }
 0x10a   :  { %v409_v43 = vpack.c.bf16 %v399_v36, %v398_v35 }
 0x10b   :  { %v408_v44 = vpack.c.bf16 %v397_v41, %v396_v40 }
 0x10d   :  { %v1141_v45 = vpop.f32.mrb[12].mxu0  ;;  %1199 = vmatprep.mubr.bf16.mxu1 %v408_v44 }
 0x10e   :  { %v226_v47 = vpop.f32.mrb[13].mxu0  ;;  %1200 = vmatmul.mubr.bf16.vlgmr.msra.gmra.mrb[8].mxu1 %v409_v43  ;;  %v402_v50 = vmul.f32 %v1141_v45, %v381_v46 }
 0x10f   :  { %v1142_v49 = vpop.f32.mrb[14].mxu0  ;;  %v400_v53 = vmul.f32 %v371_v29, %v226_v47 }
 0x110   :  { %v403_v51 = vmul.f32 %v1142_v49, %v386_v48  ;;  %v229_v52 = vpop.f32.mrb[15].mxu0 }
 0x111   :  { %v401_v54 = vmul.f32 %v376_v39, %v229_v52 }
 0x112   :  { %v411_v55 = vpack.c.bf16 %v403_v51, %v402_v50 }
 0x113   :  { %v410_v56 = vpack.c.bf16 %v401_v54, %v400_v53 }
 0x115   :  { %1203 = vmatprep.mubr.bf16.mxu1 %v410_v56 }
 0x116   :  { %1204 = vmatmul.mubr.bf16.gmra.mrb[12].mxu1 %v411_v55 }
 0x1d1   :  { %v1193_v61 = vpop.f32.mrb[16].mxu0 }
 0x1d2   :  { %v744_v62 = vadd.f32 %v1193_v61, %v1161_v32  ;;  %v735_v63 = vpop.f32.mrb[17].mxu0 }
 0x1d3   :  { %v736_v0 = vadd.f32 %v735_v63, %v590_v34  ;;  %v1194_v1 = vpop.f32.mrb[18].mxu0 }
 0x1d4   :  { %v747_v2 = vadd.f32 %v1194_v1, %v1162_v38  ;;  %v738_v3 = vpop.f32.mrb[19].mxu0  ;;  %v821_v10 = vmul.f32 %v744_v62, %v744_v62 }
 0x1d5   :  { %v739_v4 = vadd.f32 %v738_v3, %v593_v42  ;;  %v819_v6 = vmul.f32 %v736_v0, %v736_v0 }
 0x1d6   :  { %v1024_v5 = vpack.c.bf16 %v747_v2, %v744_v62  ;;  %v822_v16 = vmul.f32 %v747_v2, %v747_v2 }
 0x1d7   :  { %v798_v7 = vadd.f32 %v739_v4, %v736_v0  ;;  %v820_v8 = vmul.f32 %v739_v4, %v739_v4  ;;  %v1019_v9 = vpack.c.bf16 %v739_v4, %v736_v0 }
 0x1d8   :  { %1056 = vst [vmem:[%s1522_s6 + $0x8] sm:$0xff] %v1024_v5  }
 0x1d9   :  { %v799_v11 = vadd.f32 %v798_v7, %v744_v62  ;;  %v835_v12 = vadd.f32 %v820_v8, %v819_v6  ;;  %1020 = vst [vmem:[%s1522_s6] sm:$0xff] %v1019_v9   ;;  %v1197_v13 = vpop.f32.mrb[20].mxu0 }
 0x1da   :  { %v760_v14 = vadd.f32 %v1197_v13, %v1165_v57  ;;  %v751_v15 = vpop.f32.mrb[21].mxu0 }
 0x1db   :  { %v836_v17 = vadd.f32 %v835_v12, %v821_v10  ;;  %v752_v18 = vadd.f32 %v751_v15, %v606_v58  ;;  %v800_v19 = vadd.f32 %v799_v11, %v747_v2  ;;  %v1198_v20 = vpop.f32.mrb[22].mxu0 }
 0x1dc   :  { %v763_v21 = vadd.f32 %v1198_v20, %v1166_v59  ;;  %v754_v22 = vpop.f32.mrb[23].mxu0  ;;  %v825_v32 = vmul.f32 %v760_v14, %v760_v14 }
 0x1dd   :  { %v801_v23 = vadd.f32 %v800_v19, %v752_v18  ;;  %v823_v24 = vmul.f32 %v752_v18, %v752_v18  ;;  %v837_v25 = vadd.f32 %v836_v17, %v822_v16  ;;  %v755_v26 = vadd.f32 %v754_v22, %v609_v60 }
 0x1de   :  { %v1034_v27 = vpack.c.bf16 %v763_v21, %v760_v14  ;;  %v826_v37 = vmul.f32 %v763_v21, %v763_v21 }
 0x1df   :  { %v838_v28 = vadd.f32 %v837_v25, %v823_v24  ;;  %v802_v29 = vadd.f32 %v801_v23, %v755_v26  ;;  %v824_v30 = vmul.f32 %v755_v26, %v755_v26  ;;  %v1029_v31 = vpack.c.bf16 %v755_v26, %v752_v18 }
 0x1e0   :  { %1058 = vst [vmem:[%s1522_s6 + $0x18] sm:$0xff] %v1034_v27  }
 0x1e1   :  { %v803_v33 = vadd.f32 %v802_v29, %v760_v14  ;;  %v839_v34 = vadd.f32 %v838_v28, %v824_v30  ;;  %1057 = vst [vmem:[%s1522_s6 + $0x10] sm:$0xff] %v1029_v31   ;;  %v1201_v35 = vpop.f32.mrb[8].mxu1 }
 0x1e2   :  { %v767_v36 = vpop.f32.mrb[9].mxu1  ;;  %v829_v50 = vmul.f32 %v1201_v35, %v1201_v35 }
 0x1e3   :  { %v840_v38 = vadd.f32 %v839_v34, %v825_v32  ;;  %v804_v39 = vadd.f32 %v803_v33, %v763_v21  ;;  %v1202_v40 = vpop.f32.mrb[10].mxu1  ;;  %v827_v44 = vmul.f32 %v767_v36, %v767_v36 }
 0x1e4   :  { %v1044_v41 = vpack.c.bf16 %v1202_v40, %v1201_v35  ;;  %v770_v42 = vpop.f32.mrb[11].mxu1  ;;  %v830_v55 = vmul.f32 %v1202_v40, %v1202_v40 }
 0x1e5   :  { %v805_v43 = vadd.f32 %v804_v39, %v767_v36  ;;  %v841_v45 = vadd.f32 %v840_v38, %v826_v37  ;;  %v1039_v46 = vpack.c.bf16 %v770_v42, %v767_v36  ;;  %v828_v49 = vmul.f32 %v770_v42, %v770_v42 }
 0x1e6   :  { %1060 = vst [vmem:[%s1522_s6 + $0x28] sm:$0xff] %v1044_v41  }
 0x1e7   :  { %v842_v47 = vadd.f32 %v841_v45, %v827_v44  ;;  %v806_v48 = vadd.f32 %v805_v43, %v770_v42  ;;  %1059 = vst [vmem:[%s1522_s6 + $0x20] sm:$0xff] %v1039_v46  }
 0x1e9   :  { %v807_v51 = vadd.f32 %v1201_v35, %v806_v48  ;;  %v843_v52 = vadd.f32 %v842_v47, %v828_v49  ;;  %v1205_v53 = vpop.f32.mrb[12].mxu1 }
 0x1ea   :  { %v783_v54 = vpop.f32.mrb[13].mxu1  ;;  %v833_v4 = vmul.f32 %v1205_v53, %v1205_v53 }
 0x1eb   :  { %v844_v56 = vadd.f32 %v843_v52, %v829_v50  ;;  %v808_v57 = vadd.f32 %v1202_v40, %v807_v51  ;;  %v1206_v58 = vpop.f32.mrb[14].mxu1  ;;  %v831_v62 = vmul.f32 %v783_v54, %v783_v54 }
 0x1ec   :  { %v1054_v59 = vpack.c.bf16 %v1206_v58, %v1205_v53  ;;  %v786_v60 = vpop.f32.mrb[15].mxu1  ;;  %v834_v7 = vmul.f32 %v1206_v58, %v1206_v58 }
 0x1ed   :  { %v809_v61 = vadd.f32 %v808_v57, %v783_v54  ;;  %v845_v63 = vadd.f32 %v844_v56, %v830_v55  ;;  %v1049_v0 = vpack.c.bf16 %v786_v60, %v783_v54  ;;  %v832_v3 = vmul.f32 %v786_v60, %v786_v60 }
 0x1ee   :  { %1062 = vst [vmem:[%s1522_s6 + $0x38] sm:$0xff] %v1054_v59  }
 0x1ef   :  { %v846_v1 = vadd.f32 %v845_v63, %v831_v62  ;;  %v810_v2 = vadd.f32 %v809_v61, %v786_v60  ;;  %1061 = vst [vmem:[%s1522_s6 + $0x30] sm:$0xff] %v1049_v0  }
 0x1f1   :  { %v811_v5 = vadd.f32 %v1205_v53, %v810_v2  ;;  %v847_v6 = vadd.f32 %v846_v1, %v832_v3 }
 0x1f3   :  { %v812_v8 = vadd.f32 %v1206_v58, %v811_v5  ;;  %v848_v9 = vadd.f32 %v847_v6, %v833_v4 }
 0x1f5   :  { %v813_v10 = vrot.slane %v812_v8, 4  ;;  %v849_v11 = vadd.f32 %v848_v9, %v834_v7 }
 0x1f7   :  { %v814_v12 = vadd.f32 %v813_v10, %v812_v8  ;;  %v850_v13 = vrot.slane %v849_v11, 4 }
 0x1f9   :  { %v815_v14 = vrot.slane %v814_v12, 2  ;;  %v851_v15 = vadd.f32 %v850_v13, %v849_v11 }
 0x1fb   :  { %v816_v16 = vadd.f32 %v815_v14, %v814_v12  ;;  %v852_v17 = vrot.slane %v851_v15, 2 }
 0x1fd   :  { %v817_v18 = vrot.slane %v816_v16, 1  ;;  %v853_v19 = vadd.f32 %v852_v17, %v851_v15 }
 0x1ff   :  { %v818_v20 = vadd.f32 %v817_v18, %v816_v16  ;;  %v854_v21 = vrot.slane %v853_v19, 1 }
 0x201   :  { %v855_v22 = vadd.f32 %v854_v21, %v853_v19  ;;  %856 = vst [vmem:[%s1523_s7] sm:$0xff] %v818_v20 }
 0x203   :  { %857 = vst [vmem:[%s1524_s8] sm:$0xff] %v855_v22 }

</bundles_post_ra>
